<compile_context>
chip_gen: v6e
topology: v6e:2x2x1
jax: 0.10.0
libtpu: 0.0.40
codegen_flags: <defaults>
</compile_context>

<pallas_src>
import functools
import math

import numpy as np

import jax
import jax.numpy as jnp
from jax.experimental import pallas as pl
from jax.experimental.pallas import tpu as pltpu


def _lstm_chunk_kernel(gx_ref, whh_ref, h0_ref, c0_ref,
                       out_ref, hn_ref, cn_ref, *, hidden_size, chunk):
    """One grid step == one chunk of `chunk` timesteps of the LSTM recurrence.

    gx_ref:  [TC, B, 4H]  precomputed x @ W_ih^T + bias for this chunk
    whh_ref: [H, 4H]      hidden->gates weight (pre-transposed, VMEM resident)
    h0_ref:  [B, H]       initial hidden state
    c0_ref:  [B, H]       initial cell state
    out_ref: [TC, B, H]   this chunk's output slab
    hn_ref:  [B, H]       carried hidden state (constant-index resident block)
    cn_ref:  [B, H]       carried cell state   (constant-index resident block)
    """
    H = hidden_size

    @pl.when(pl.program_id(0) == 0)
    def _():
        hn_ref[...] = h0_ref[...]
        cn_ref[...] = c0_ref[...]

    whh = whh_ref[...]                         # hoisted: one VMEM load per chunk
    h = hn_ref[...].astype(jnp.float32)
    c = cn_ref[...].astype(jnp.float32)

    def step(t, carry):
        h, c = carry
        # Only the recurrent matmul sits on the serial critical path.
        gates = gx_ref[t] + jnp.dot(h, whh, preferred_element_type=jnp.float32)
        # PyTorch gate order along 4H: i, f, g, o.
        i = jax.nn.sigmoid(gates[:, 0 * H:1 * H])
        f = jax.nn.sigmoid(gates[:, 1 * H:2 * H])
        g = jnp.tanh(gates[:, 2 * H:3 * H])
        o = jax.nn.sigmoid(gates[:, 3 * H:4 * H])
        c_new = f * c + i * g
        h_new = o * jnp.tanh(c_new)
        out_ref[t] = h_new.astype(out_ref.dtype)
        return h_new, c_new

    h, c = jax.lax.fori_loop(0, chunk, step, (h, c), unroll=True)

    # One state writeback per chunk (not per timestep).
    hn_ref[...] = h.astype(hn_ref.dtype)
    cn_ref[...] = c.astype(cn_ref.dtype)


def encoder_forward(inputs, wih_t, whh_t, bias, hidden0=None, *, time_chunk=32):
    """LSTM forward matching nn.LSTM(batch_first=True).

    inputs: [B, T, I] float32
    wih_t:  [I, 4H]   == weight_ih_l0.T   (pre-transposed once at init)
    whh_t:  [H, 4H]   == weight_hh_l0.T
    bias:   [1, 4H]   == (bias_ih_l0 + bias_hh_l0)[None]
    hidden0: optional (h0, c0), each [1, B, H] (PyTorch layout) or [B, H].

    Returns (output [B, T, H], (h_n [1, B, H], c_n [1, B, H])).
    """
    B, T, I = inputs.shape
    H = whh_t.shape[0]
    G = 4 * H

    # Largest chunk size <= time_chunk that divides T (static Python ints).
    tc = max(d for d in range(1, min(T, time_chunk) + 1) if T % d == 0)
    num_chunks = T // tc

    if hidden0 is None:
        h0 = jnp.zeros((B, H), jnp.float32)
        c0 = jnp.zeros((B, H), jnp.float32)
    else:
        h0, c0 = hidden0
        h0 = jnp.asarray(h0, jnp.float32).reshape(B, H)
        c0 = jnp.asarray(c0, jnp.float32).reshape(B, H)

    # Hoisted input projection: one big parallel matmul over all T*B rows
    # (done by XLA, off the serial path).  Output is time-major so each grid
    # step streams exactly its (tc, B, 4H) slab.
    gates_x = jnp.einsum(
        "bti,ig->tbg", inputs.astype(jnp.float32), wih_t,
        precision=jax.lax.Precision.HIGHEST) + bias            # [T, B, 4H]

    out_tm, h_n, c_n = pl.pallas_call(
        functools.partial(_lstm_chunk_kernel, hidden_size=H, chunk=tc),
        out_shape=(
            jax.ShapeDtypeStruct((T, B, H), inputs.dtype),
            jax.ShapeDtypeStruct((B, H), jnp.float32),
            jax.ShapeDtypeStruct((B, H), jnp.float32),
        ),
        grid_spec=pltpu.PrefetchScalarGridSpec(
            num_scalar_prefetch=0,
            grid=(num_chunks,),
            in_specs=[
                pl.BlockSpec((tc, B, G), lambda c: (c, 0, 0)),   # gates_x chunk
                pl.BlockSpec((H, G), lambda c: (0, 0)),          # W_hh^T resident
                pl.BlockSpec((B, H), lambda c: (0, 0)),          # h0 resident
                pl.BlockSpec((B, H), lambda c: (0, 0)),          # c0 resident
            ],
            out_specs=(
                pl.BlockSpec((tc, B, H), lambda c: (c, 0, 0)),   # output slab
                pl.BlockSpec((B, H), lambda c: (0, 0)),          # h_n carry
                pl.BlockSpec((B, H), lambda c: (0, 0)),          # c_n carry
            ),
        ),
        compiler_params=pltpu.CompilerParams(
            # The time-chunk axis is a true recurrence -> sequential.
            dimension_semantics=("arbitrary",),
            vmem_limit_bytes=32 * 1024 * 1024,
        ),
    )(gates_x, whh_t, h0, c0)

    output = jnp.swapaxes(out_tm, 0, 1)                         # [B, T, H]
    return output, (h_n[None, ...], c_n[None, ...])


def lstm_reference_np(x, w_ih, w_hh, b_ih, b_hh, h0, c0):
    """float64 NumPy reference (same math / gate order as nn.LSTM)."""
    x = np.asarray(x, np.float64)
    w_ih = np.asarray(w_ih, np.float64)
    w_hh = np.asarray(w_hh, np.float64)
    b = np.asarray(b_ih, np.float64) + np.asarray(b_hh, np.float64)
    h = np.asarray(h0, np.float64)
    c = np.asarray(c0, np.float64)
    H = w_hh.shape[1]
    T = x.shape[1]

    def sigmoid(z):
        return 1.0 / (1.0 + np.exp(-z))

    outs = []
    for t in range(T):
        gates = x[:, t, :] @ w_ih.T + h @ w_hh.T + b
        i = sigmoid(gates[:, 0 * H:1 * H])
        f = sigmoid(gates[:, 1 * H:2 * H])
        g = np.tanh(gates[:, 2 * H:3 * H])
        o = sigmoid(gates[:, 3 * H:4 * H])
        c = f * c + i * g
        h = o * np.tanh(c)
        outs.append(h)
    return np.stack(outs, axis=1), h, c


if __name__ == "__main__":
    # Small shapes consistent with the module: batch=8 (fills the sublanes),
    # seq=16 (two time chunks -> exercises the carried state), inputDim=16,
    # hiddenDim=32 (outputDim is unused by Encoder.forward).
    B, T, I, H = 8, 16, 16, 32

    key = jax.random.PRNGKey(0)
    kx, kw1, kw2, kb1, kb2 = jax.random.split(key, 5)

    inputs = jax.random.normal(kx, (B, T, I), dtype=jnp.float32)

    # torch.nn.LSTM default init: U(-1/sqrt(H), 1/sqrt(H)), PyTorch layout
    # weight_ih [4H, I], weight_hh [4H, H], biases [4H].
    bound = 1.0 / math.sqrt(H)
    w_ih = jax.random.uniform(kw1, (4 * H, I), minval=-bound, maxval=bound,
                              dtype=jnp.float32)
    w_hh = jax.random.uniform(kw2, (4 * H, H), minval=-bound, maxval=bound,
                              dtype=jnp.float32)
    b_ih = jax.random.uniform(kb1, (4 * H,), minval=-bound, maxval=bound,
                              dtype=jnp.float32)
    b_hh = jax.random.uniform(kb2, (4 * H,), minval=-bound, maxval=bound,
                              dtype=jnp.float32)

    # One-time (init-time) re-layout — no per-call transposes in the hot path.
    wih_t = jnp.asarray(w_ih.T)                       # [I, 4H]
    whh_t = jnp.asarray(w_hh.T)                       # [H, 4H]
    bias = (b_ih + b_hh).reshape(1, 4 * H)            # [1, 4H]

    fwd = jax.jit(encoder_forward)
    output, (h_n, c_n) = fwd(inputs, wih_t, whh_t, bias)
    output = jax.block_until_ready(output)
    h_n = jax.block_until_ready(h_n)
    c_n = jax.block_until_ready(c_n)

    # float64 reference check (tolerance covers a bf16-pass MXU f32 path).
    h0 = np.zeros((B, H), np.float64)
    c0 = np.zeros((B, H), np.float64)
    ref_out, ref_h, ref_c = lstm_reference_np(
        np.asarray(inputs), np.asarray(w_ih), np.asarray(w_hh),
        np.asarray(b_ih), np.asarray(b_hh), h0, c0)

    assert output.shape == (B, T, H)
    assert h_n.shape == (1, B, H) and c_n.shape == (1, B, H)
    assert np.allclose(np.asarray(output), ref_out, atol=5e-3, rtol=5e-3)
    assert np.allclose(np.asarray(h_n[0]), ref_h, atol=5e-3, rtol=5e-3)
    assert np.allclose(np.asarray(c_n[0]), ref_c, atol=5e-3, rtol=5e-3)

    print("KERNEL_OK")
</pallas_src>

<mosaic_0001>
module attributes {stable_mosaic.version = 11 : i64} {
  func.func @_lstm_chunk_kernel(%arg0: i32, %arg1: memref<16x8x128xf32, #tpu.memory_space<vmem>>, %arg2: memref<32x128xf32, #tpu.memory_space<vmem>>, %arg3: memref<8x32xf32, #tpu.memory_space<vmem>>, %arg4: memref<8x32xf32, #tpu.memory_space<vmem>>, %arg5: memref<16x8x32xf32, #tpu.memory_space<vmem>>, %arg6: memref<8x32xf32, #tpu.memory_space<vmem>>, %arg7: memref<8x32xf32, #tpu.memory_space<vmem>>) attributes {dimension_semantics = [#tpu.dimension_semantics<arbitrary>], iteration_bounds = array<i64: 1>, scalar_prefetch = 0 : i64, scratch_operands = 0 : i64, tpu.core_type = #tpu.core_type<tc>, window_params = [{transform_indices = @transform_0, window_bounds = array<i64: 16, 8, 128>}, {pipeline_mode = #tpu.pipeline_mode<synchronous>, transform_indices = @transform_1, window_bounds = array<i64: 32, 128>}, {pipeline_mode = #tpu.pipeline_mode<synchronous>, transform_indices = @transform_2, window_bounds = array<i64: 8, 32>}, {pipeline_mode = #tpu.pipeline_mode<synchronous>, transform_indices = @transform_3, window_bounds = array<i64: 8, 32>}, {transform_indices = @transform_4, window_bounds = array<i64: 16, 8, 32>}, {pipeline_mode = #tpu.pipeline_mode<synchronous>, transform_indices = @transform_5, window_bounds = array<i64: 8, 32>}, {pipeline_mode = #tpu.pipeline_mode<synchronous>, transform_indices = @transform_6, window_bounds = array<i64: 8, 32>}]} {
    %c0_i32 = arith.constant 0 : i32
    %0 = arith.cmpi eq, %arg0, %c0_i32 : i32
    %1 = arith.extui %0 : i1 to i32
    %c0_i32_0 = arith.constant 0 : i32
    %2 = arith.cmpi ne, %1, %c0_i32_0 : i32
    scf.if %2 {
      %c0_138 = arith.constant 0 : index
      %c0_139 = arith.constant 0 : index
      %552 = vector.load %arg3[%c0_138, %c0_139] : memref<8x32xf32, #tpu.memory_space<vmem>>, vector<8x32xf32>
      %c0_140 = arith.constant 0 : index
      %c0_141 = arith.constant 0 : index
      %553 = vector.load %arg6[%c0_140, %c0_141] : memref<8x32xf32, #tpu.memory_space<vmem>>, vector<8x32xf32>
      tpu.vector_store %arg6[%c0_140, %c0_141], %552 {strides = array<i32>} : memref<8x32xf32, #tpu.memory_space<vmem>>, vector<8x32xf32>,
      %c0_142 = arith.constant 0 : index
      %c0_143 = arith.constant 0 : index
      %554 = vector.load %arg4[%c0_142, %c0_143] : memref<8x32xf32, #tpu.memory_space<vmem>>, vector<8x32xf32>
      %c0_144 = arith.constant 0 : index
      %c0_145 = arith.constant 0 : index
      %555 = vector.load %arg7[%c0_144, %c0_145] : memref<8x32xf32, #tpu.memory_space<vmem>>, vector<8x32xf32>
      tpu.vector_store %arg7[%c0_144, %c0_145], %554 {strides = array<i32>} : memref<8x32xf32, #tpu.memory_space<vmem>>, vector<8x32xf32>,
    } else {
    }
    %c0 = arith.constant 0 : index
    %c0_1 = arith.constant 0 : index
    %3 = vector.load %arg2[%c0, %c0_1] : memref<32x128xf32, #tpu.memory_space<vmem>>, vector<32x128xf32>
    %c0_2 = arith.constant 0 : index
    %c0_3 = arith.constant 0 : index
    %4 = vector.load %arg6[%c0_2, %c0_3] : memref<8x32xf32, #tpu.memory_space<vmem>>, vector<8x32xf32>
    %c0_4 = arith.constant 0 : index
    %c0_5 = arith.constant 0 : index
    %5 = vector.load %arg7[%c0_4, %c0_5] : memref<8x32xf32, #tpu.memory_space<vmem>>, vector<8x32xf32>
    %c0_i32_6 = arith.constant 0 : i32
    %6 = arith.index_cast %c0_i32_6 : i32 to index
    %c0_7 = arith.constant 0 : index
    %c0_8 = arith.constant 0 : index
    %7 = vector.load %arg1[%6, %c0_7, %c0_8] : memref<16x8x128xf32, #tpu.memory_space<vmem>>, vector<1x8x128xf32>
    %8 = vector.shape_cast %7 : vector<1x8x128xf32> to vector<8x128xf32>
    %cst = arith.constant dense<0.000000e+00> : vector<8x128xf32>
    %9 = tpu.matmul %4, %3, %cst {dimension_numbers = #tpu.dot_dimension_numbers<[1], [0], [0], [1], [0, 0, 1, 1], [], []>} : vector<8x32xf32>, vector<32x128xf32>, vector<8x128xf32> -> vector<8x128xf32>
    %10 = arith.addf %8, %9 : vector<8x128xf32>
    %11 = vector.extract_strided_slice %10 {offsets = [0, 0], sizes = [8, 32], strides = [1, 1]} : vector<8x128xf32> to vector<8x32xf32>
    %12 = arith.negf %11 : vector<8x32xf32>
    %13 = math.exp %12 : vector<8x32xf32>
    %cst_9 = arith.constant 1.000000e+00 : f32
    %14 = vector.broadcast %cst_9 : f32 to vector<8x32xf32>
    %15 = arith.addf %14, %13 : vector<8x32xf32>
    %16 = arith.divf %14, %15 : vector<8x32xf32>
    %17 = vector.extract_strided_slice %10 {offsets = [0, 32], sizes = [8, 32], strides = [1, 1]} : vector<8x128xf32> to vector<8x32xf32>
    %18 = arith.negf %17 : vector<8x32xf32>
    %19 = math.exp %18 : vector<8x32xf32>
    %cst_10 = arith.constant 1.000000e+00 : f32
    %20 = vector.broadcast %cst_10 : f32 to vector<8x32xf32>
    %21 = arith.addf %20, %19 : vector<8x32xf32>
    %22 = arith.divf %20, %21 : vector<8x32xf32>
    %23 = vector.extract_strided_slice %10 {offsets = [0, 64], sizes = [8, 32], strides = [1, 1]} : vector<8x128xf32> to vector<8x32xf32>
    %24 = math.tanh %23 : vector<8x32xf32>
    %25 = vector.extract_strided_slice %10 {offsets = [0, 96], sizes = [8, 32], strides = [1, 1]} : vector<8x128xf32> to vector<8x32xf32>
    %26 = arith.negf %25 : vector<8x32xf32>
    %27 = math.exp %26 : vector<8x32xf32>
    %cst_11 = arith.constant 1.000000e+00 : f32
    %28 = vector.broadcast %cst_11 : f32 to vector<8x32xf32>
    %29 = arith.addf %28, %27 : vector<8x32xf32>
    %30 = arith.divf %28, %29 : vector<8x32xf32>
    %31 = arith.mulf %22, %5 : vector<8x32xf32>
    %32 = arith.mulf %16, %24 : vector<8x32xf32>
    %33 = arith.addf %31, %32 : vector<8x32xf32>
    %34 = math.tanh %33 : vector<8x32xf32>
    %35 = arith.mulf %30, %34 : vector<8x32xf32>
    %36 = arith.index_cast %c0_i32_6 : i32 to index
    %c0_12 = arith.constant 0 : index
    %c0_13 = arith.constant 0 : index
    %37 = vector.load %arg5[%36, %c0_12, %c0_13] : memref<16x8x32xf32, #tpu.memory_space<vmem>>, vector<1x8x32xf32>
    %38 = vector.shape_cast %37 : vector<1x8x32xf32> to vector<8x32xf32>
    %39 = vector.shape_cast %35 : vector<8x32xf32> to vector<1x8x32xf32>
    tpu.vector_store %arg5[%36, %c0_12, %c0_13], %39 {strides = array<i32>} : memref<16x8x32xf32, #tpu.memory_space<vmem>>, vector<1x8x32xf32>,
    %c1_i32 = arith.constant 1 : i32
    %40 = arith.index_cast %c1_i32 : i32 to index
    %c0_14 = arith.constant 0 : index
    %c0_15 = arith.constant 0 : index
    %41 = vector.load %arg1[%40, %c0_14, %c0_15] : memref<16x8x128xf32, #tpu.memory_space<vmem>>, vector<1x8x128xf32>
    %42 = vector.shape_cast %41 : vector<1x8x128xf32> to vector<8x128xf32>
    %cst_16 = arith.constant dense<0.000000e+00> : vector<8x128xf32>
    %43 = tpu.matmul %35, %3, %cst_16 {dimension_numbers = #tpu.dot_dimension_numbers<[1], [0], [0], [1], [0, 0, 1, 1], [], []>} : vector<8x32xf32>, vector<32x128xf32>, vector<8x128xf32> -> vector<8x128xf32>
    %44 = arith.addf %42, %43 : vector<8x128xf32>
    %45 = vector.extract_strided_slice %44 {offsets = [0, 0], sizes = [8, 32], strides = [1, 1]} : vector<8x128xf32> to vector<8x32xf32>
    %46 = arith.negf %45 : vector<8x32xf32>
    %47 = math.exp %46 : vector<8x32xf32>
    %cst_17 = arith.constant 1.000000e+00 : f32
    %48 = vector.broadcast %cst_17 : f32 to vector<8x32xf32>
    %49 = arith.addf %48, %47 : vector<8x32xf32>
    %50 = arith.divf %48, %49 : vector<8x32xf32>
    %51 = vector.extract_strided_slice %44 {offsets = [0, 32], sizes = [8, 32], strides = [1, 1]} : vector<8x128xf32> to vector<8x32xf32>
    %52 = arith.negf %51 : vector<8x32xf32>
    %53 = math.exp %52 : vector<8x32xf32>
    %cst_18 = arith.constant 1.000000e+00 : f32
    %54 = vector.broadcast %cst_18 : f32 to vector<8x32xf32>
    %55 = arith.addf %54, %53 : vector<8x32xf32>
    %56 = arith.divf %54, %55 : vector<8x32xf32>
    %57 = vector.extract_strided_slice %44 {offsets = [0, 64], sizes = [8, 32], strides = [1, 1]} : vector<8x128xf32> to vector<8x32xf32>
    %58 = math.tanh %57 : vector<8x32xf32>
    %59 = vector.extract_strided_slice %44 {offsets = [0, 96], sizes = [8, 32], strides = [1, 1]} : vector<8x128xf32> to vector<8x32xf32>
    %60 = arith.negf %59 : vector<8x32xf32>
    %61 = math.exp %60 : vector<8x32xf32>
    %cst_19 = arith.constant 1.000000e+00 : f32
    %62 = vector.broadcast %cst_19 : f32 to vector<8x32xf32>
    %63 = arith.addf %62, %61 : vector<8x32xf32>
    %64 = arith.divf %62, %63 : vector<8x32xf32>
    %65 = arith.mulf %56, %33 : vector<8x32xf32>
    %66 = arith.mulf %50, %58 : vector<8x32xf32>
    %67 = arith.addf %65, %66 : vector<8x32xf32>
    %68 = math.tanh %67 : vector<8x32xf32>
    %69 = arith.mulf %64, %68 : vector<8x32xf32>
    %70 = arith.index_cast %c1_i32 : i32 to index
    %c0_20 = arith.constant 0 : index
    %c0_21 = arith.constant 0 : index
    %71 = vector.load %arg5[%70, %c0_20, %c0_21] : memref<16x8x32xf32, #tpu.memory_space<vmem>>, vector<1x8x32xf32>
    %72 = vector.shape_cast %71 : vector<1x8x32xf32> to vector<8x32xf32>
    %73 = vector.shape_cast %69 : vector<8x32xf32> to vector<1x8x32xf32>
    tpu.vector_store %arg5[%70, %c0_20, %c0_21], %73 {strides = array<i32>} : memref<16x8x32xf32, #tpu.memory_space<vmem>>, vector<1x8x32xf32>,
    %c2_i32 = arith.constant 2 : i32
    %74 = arith.index_cast %c2_i32 : i32 to index
    %c0_22 = arith.constant 0 : index
    %c0_23 = arith.constant 0 : index
    %75 = vector.load %arg1[%74, %c0_22, %c0_23] : memref<16x8x128xf32, #tpu.memory_space<vmem>>, vector<1x8x128xf32>
    %76 = vector.shape_cast %75 : vector<1x8x128xf32> to vector<8x128xf32>
    %cst_24 = arith.constant dense<0.000000e+00> : vector<8x128xf32>
    %77 = tpu.matmul %69, %3, %cst_24 {dimension_numbers = #tpu.dot_dimension_numbers<[1], [0], [0], [1], [0, 0, 1, 1], [], []>} : vector<8x32xf32>, vector<32x128xf32>, vector<8x128xf32> -> vector<8x128xf32>
    %78 = arith.addf %76, %77 : vector<8x128xf32>
    %79 = vector.extract_strided_slice %78 {offsets = [0, 0], sizes = [8, 32], strides = [1, 1]} : vector<8x128xf32> to vector<8x32xf32>
    %80 = arith.negf %79 : vector<8x32xf32>
    %81 = math.exp %80 : vector<8x32xf32>
    %cst_25 = arith.constant 1.000000e+00 : f32
    %82 = vector.broadcast %cst_25 : f32 to vector<8x32xf32>
    %83 = arith.addf %82, %81 : vector<8x32xf32>
    %84 = arith.divf %82, %83 : vector<8x32xf32>
    %85 = vector.extract_strided_slice %78 {offsets = [0, 32], sizes = [8, 32], strides = [1, 1]} : vector<8x128xf32> to vector<8x32xf32>
    %86 = arith.negf %85 : vector<8x32xf32>
    %87 = math.exp %86 : vector<8x32xf32>
    %cst_26 = arith.constant 1.000000e+00 : f32
    %88 = vector.broadcast %cst_26 : f32 to vector<8x32xf32>
    %89 = arith.addf %88, %87 : vector<8x32xf32>
    %90 = arith.divf %88, %89 : vector<8x32xf32>
    %91 = vector.extract_strided_slice %78 {offsets = [0, 64], sizes = [8, 32], strides = [1, 1]} : vector<8x128xf32> to vector<8x32xf32>
    %92 = math.tanh %91 : vector<8x32xf32>
    %93 = vector.extract_strided_slice %78 {offsets = [0, 96], sizes = [8, 32], strides = [1, 1]} : vector<8x128xf32> to vector<8x32xf32>
    %94 = arith.negf %93 : vector<8x32xf32>
    %95 = math.exp %94 : vector<8x32xf32>
    %cst_27 = arith.constant 1.000000e+00 : f32
    %96 = vector.broadcast %cst_27 : f32 to vector<8x32xf32>
    %97 = arith.addf %96, %95 : vector<8x32xf32>
    %98 = arith.divf %96, %97 : vector<8x32xf32>
    %99 = arith.mulf %90, %67 : vector<8x32xf32>
    %100 = arith.mulf %84, %92 : vector<8x32xf32>
    %101 = arith.addf %99, %100 : vector<8x32xf32>
    %102 = math.tanh %101 : vector<8x32xf32>
    %103 = arith.mulf %98, %102 : vector<8x32xf32>
    %104 = arith.index_cast %c2_i32 : i32 to index
    %c0_28 = arith.constant 0 : index
    %c0_29 = arith.constant 0 : index
    %105 = vector.load %arg5[%104, %c0_28, %c0_29] : memref<16x8x32xf32, #tpu.memory_space<vmem>>, vector<1x8x32xf32>
    %106 = vector.shape_cast %105 : vector<1x8x32xf32> to vector<8x32xf32>
    %107 = vector.shape_cast %103 : vector<8x32xf32> to vector<1x8x32xf32>
    tpu.vector_store %arg5[%104, %c0_28, %c0_29], %107 {strides = array<i32>} : memref<16x8x32xf32, #tpu.memory_space<vmem>>, vector<1x8x32xf32>,
    %c3_i32 = arith.constant 3 : i32
    %108 = arith.index_cast %c3_i32 : i32 to index
    %c0_30 = arith.constant 0 : index
    %c0_31 = arith.constant 0 : index
    %109 = vector.load %arg1[%108, %c0_30, %c0_31] : memref<16x8x128xf32, #tpu.memory_space<vmem>>, vector<1x8x128xf32>
    %110 = vector.shape_cast %109 : vector<1x8x128xf32> to vector<8x128xf32>
    %cst_32 = arith.constant dense<0.000000e+00> : vector<8x128xf32>
    %111 = tpu.matmul %103, %3, %cst_32 {dimension_numbers = #tpu.dot_dimension_numbers<[1], [0], [0], [1], [0, 0, 1, 1], [], []>} : vector<8x32xf32>, vector<32x128xf32>, vector<8x128xf32> -> vector<8x128xf32>
    %112 = arith.addf %110, %111 : vector<8x128xf32>
    %113 = vector.extract_strided_slice %112 {offsets = [0, 0], sizes = [8, 32], strides = [1, 1]} : vector<8x128xf32> to vector<8x32xf32>
    %114 = arith.negf %113 : vector<8x32xf32>
    %115 = math.exp %114 : vector<8x32xf32>
    %cst_33 = arith.constant 1.000000e+00 : f32
    %116 = vector.broadcast %cst_33 : f32 to vector<8x32xf32>
    %117 = arith.addf %116, %115 : vector<8x32xf32>
    %118 = arith.divf %116, %117 : vector<8x32xf32>
    %119 = vector.extract_strided_slice %112 {offsets = [0, 32], sizes = [8, 32], strides = [1, 1]} : vector<8x128xf32> to vector<8x32xf32>
    %120 = arith.negf %119 : vector<8x32xf32>
    %121 = math.exp %120 : vector<8x32xf32>
    %cst_34 = arith.constant 1.000000e+00 : f32
    %122 = vector.broadcast %cst_34 : f32 to vector<8x32xf32>
    %123 = arith.addf %122, %121 : vector<8x32xf32>
    %124 = arith.divf %122, %123 : vector<8x32xf32>
    %125 = vector.extract_strided_slice %112 {offsets = [0, 64], sizes = [8, 32], strides = [1, 1]} : vector<8x128xf32> to vector<8x32xf32>
    %126 = math.tanh %125 : vector<8x32xf32>
    %127 = vector.extract_strided_slice %112 {offsets = [0, 96], sizes = [8, 32], strides = [1, 1]} : vector<8x128xf32> to vector<8x32xf32>
    %128 = arith.negf %127 : vector<8x32xf32>
    %129 = math.exp %128 : vector<8x32xf32>
    %cst_35 = arith.constant 1.000000e+00 : f32
    %130 = vector.broadcast %cst_35 : f32 to vector<8x32xf32>
    %131 = arith.addf %130, %129 : vector<8x32xf32>
    %132 = arith.divf %130, %131 : vector<8x32xf32>
    %133 = arith.mulf %124, %101 : vector<8x32xf32>
    %134 = arith.mulf %118, %126 : vector<8x32xf32>
    %135 = arith.addf %133, %134 : vector<8x32xf32>
    %136 = math.tanh %135 : vector<8x32xf32>
    %137 = arith.mulf %132, %136 : vector<8x32xf32>
    %138 = arith.index_cast %c3_i32 : i32 to index
    %c0_36 = arith.constant 0 : index
    %c0_37 = arith.constant 0 : index
    %139 = vector.load %arg5[%138, %c0_36, %c0_37] : memref<16x8x32xf32, #tpu.memory_space<vmem>>, vector<1x8x32xf32>
    %140 = vector.shape_cast %139 : vector<1x8x32xf32> to vector<8x32xf32>
    %141 = vector.shape_cast %137 : vector<8x32xf32> to vector<1x8x32xf32>
    tpu.vector_store %arg5[%138, %c0_36, %c0_37], %141 {strides = array<i32>} : memref<16x8x32xf32, #tpu.memory_space<vmem>>, vector<1x8x32xf32>,
    %c4_i32 = arith.constant 4 : i32
    %142 = arith.index_cast %c4_i32 : i32 to index
    %c0_38 = arith.constant 0 : index
    %c0_39 = arith.constant 0 : index
    %143 = vector.load %arg1[%142, %c0_38, %c0_39] : memref<16x8x128xf32, #tpu.memory_space<vmem>>, vector<1x8x128xf32>
    %144 = vector.shape_cast %143 : vector<1x8x128xf32> to vector<8x128xf32>
    %cst_40 = arith.constant dense<0.000000e+00> : vector<8x128xf32>
    %145 = tpu.matmul %137, %3, %cst_40 {dimension_numbers = #tpu.dot_dimension_numbers<[1], [0], [0], [1], [0, 0, 1, 1], [], []>} : vector<8x32xf32>, vector<32x128xf32>, vector<8x128xf32> -> vector<8x128xf32>
    %146 = arith.addf %144, %145 : vector<8x128xf32>
    %147 = vector.extract_strided_slice %146 {offsets = [0, 0], sizes = [8, 32], strides = [1, 1]} : vector<8x128xf32> to vector<8x32xf32>
    %148 = arith.negf %147 : vector<8x32xf32>
    %149 = math.exp %148 : vector<8x32xf32>
    %cst_41 = arith.constant 1.000000e+00 : f32
    %150 = vector.broadcast %cst_41 : f32 to vector<8x32xf32>
    %151 = arith.addf %150, %149 : vector<8x32xf32>
    %152 = arith.divf %150, %151 : vector<8x32xf32>
    %153 = vector.extract_strided_slice %146 {offsets = [0, 32], sizes = [8, 32], strides = [1, 1]} : vector<8x128xf32> to vector<8x32xf32>
    %154 = arith.negf %153 : vector<8x32xf32>
    %155 = math.exp %154 : vector<8x32xf32>
    %cst_42 = arith.constant 1.000000e+00 : f32
    %156 = vector.broadcast %cst_42 : f32 to vector<8x32xf32>
    %157 = arith.addf %156, %155 : vector<8x32xf32>
    %158 = arith.divf %156, %157 : vector<8x32xf32>
    %159 = vector.extract_strided_slice %146 {offsets = [0, 64], sizes = [8, 32], strides = [1, 1]} : vector<8x128xf32> to vector<8x32xf32>
    %160 = math.tanh %159 : vector<8x32xf32>
    %161 = vector.extract_strided_slice %146 {offsets = [0, 96], sizes = [8, 32], strides = [1, 1]} : vector<8x128xf32> to vector<8x32xf32>
    %162 = arith.negf %161 : vector<8x32xf32>
    %163 = math.exp %162 : vector<8x32xf32>
    %cst_43 = arith.constant 1.000000e+00 : f32
    %164 = vector.broadcast %cst_43 : f32 to vector<8x32xf32>
    %165 = arith.addf %164, %163 : vector<8x32xf32>
    %166 = arith.divf %164, %165 : vector<8x32xf32>
    %167 = arith.mulf %158, %135 : vector<8x32xf32>
    %168 = arith.mulf %152, %160 : vector<8x32xf32>
    %169 = arith.addf %167, %168 : vector<8x32xf32>
    %170 = math.tanh %169 : vector<8x32xf32>
    %171 = arith.mulf %166, %170 : vector<8x32xf32>
    %172 = arith.index_cast %c4_i32 : i32 to index
    %c0_44 = arith.constant 0 : index
    %c0_45 = arith.constant 0 : index
    %173 = vector.load %arg5[%172, %c0_44, %c0_45] : memref<16x8x32xf32, #tpu.memory_space<vmem>>, vector<1x8x32xf32>
    %174 = vector.shape_cast %173 : vector<1x8x32xf32> to vector<8x32xf32>
    %175 = vector.shape_cast %171 : vector<8x32xf32> to vector<1x8x32xf32>
    tpu.vector_store %arg5[%172, %c0_44, %c0_45], %175 {strides = array<i32>} : memref<16x8x32xf32, #tpu.memory_space<vmem>>, vector<1x8x32xf32>,
    %c5_i32 = arith.constant 5 : i32
    %176 = arith.index_cast %c5_i32 : i32 to index
    %c0_46 = arith.constant 0 : index
    %c0_47 = arith.constant 0 : index
    %177 = vector.load %arg1[%176, %c0_46, %c0_47] : memref<16x8x128xf32, #tpu.memory_space<vmem>>, vector<1x8x128xf32>
    %178 = vector.shape_cast %177 : vector<1x8x128xf32> to vector<8x128xf32>
    %cst_48 = arith.constant dense<0.000000e+00> : vector<8x128xf32>
    %179 = tpu.matmul %171, %3, %cst_48 {dimension_numbers = #tpu.dot_dimension_numbers<[1], [0], [0], [1], [0, 0, 1, 1], [], []>} : vector<8x32xf32>, vector<32x128xf32>, vector<8x128xf32> -> vector<8x128xf32>
    %180 = arith.addf %178, %179 : vector<8x128xf32>
    %181 = vector.extract_strided_slice %180 {offsets = [0, 0], sizes = [8, 32], strides = [1, 1]} : vector<8x128xf32> to vector<8x32xf32>
    %182 = arith.negf %181 : vector<8x32xf32>
    %183 = math.exp %182 : vector<8x32xf32>
    %cst_49 = arith.constant 1.000000e+00 : f32
    %184 = vector.broadcast %cst_49 : f32 to vector<8x32xf32>
    %185 = arith.addf %184, %183 : vector<8x32xf32>
    %186 = arith.divf %184, %185 : vector<8x32xf32>
    %187 = vector.extract_strided_slice %180 {offsets = [0, 32], sizes = [8, 32], strides = [1, 1]} : vector<8x128xf32> to vector<8x32xf32>
    %188 = arith.negf %187 : vector<8x32xf32>
    %189 = math.exp %188 : vector<8x32xf32>
    %cst_50 = arith.constant 1.000000e+00 : f32
    %190 = vector.broadcast %cst_50 : f32 to vector<8x32xf32>
    %191 = arith.addf %190, %189 : vector<8x32xf32>
    %192 = arith.divf %190, %191 : vector<8x32xf32>
    %193 = vector.extract_strided_slice %180 {offsets = [0, 64], sizes = [8, 32], strides = [1, 1]} : vector<8x128xf32> to vector<8x32xf32>
    %194 = math.tanh %193 : vector<8x32xf32>
    %195 = vector.extract_strided_slice %180 {offsets = [0, 96], sizes = [8, 32], strides = [1, 1]} : vector<8x128xf32> to vector<8x32xf32>
    %196 = arith.negf %195 : vector<8x32xf32>
    %197 = math.exp %196 : vector<8x32xf32>
    %cst_51 = arith.constant 1.000000e+00 : f32
    %198 = vector.broadcast %cst_51 : f32 to vector<8x32xf32>
    %199 = arith.addf %198, %197 : vector<8x32xf32>
    %200 = arith.divf %198, %199 : vector<8x32xf32>
    %201 = arith.mulf %192, %169 : vector<8x32xf32>
    %202 = arith.mulf %186, %194 : vector<8x32xf32>
    %203 = arith.addf %201, %202 : vector<8x32xf32>
    %204 = math.tanh %203 : vector<8x32xf32>
    %205 = arith.mulf %200, %204 : vector<8x32xf32>
    %206 = arith.index_cast %c5_i32 : i32 to index
    %c0_52 = arith.constant 0 : index
    %c0_53 = arith.constant 0 : index
    %207 = vector.load %arg5[%206, %c0_52, %c0_53] : memref<16x8x32xf32, #tpu.memory_space<vmem>>, vector<1x8x32xf32>
    %208 = vector.shape_cast %207 : vector<1x8x32xf32> to vector<8x32xf32>
    %209 = vector.shape_cast %205 : vector<8x32xf32> to vector<1x8x32xf32>
    tpu.vector_store %arg5[%206, %c0_52, %c0_53], %209 {strides = array<i32>} : memref<16x8x32xf32, #tpu.memory_space<vmem>>, vector<1x8x32xf32>,
    %c6_i32 = arith.constant 6 : i32
    %210 = arith.index_cast %c6_i32 : i32 to index
    %c0_54 = arith.constant 0 : index
    %c0_55 = arith.constant 0 : index
    %211 = vector.load %arg1[%210, %c0_54, %c0_55] : memref<16x8x128xf32, #tpu.memory_space<vmem>>, vector<1x8x128xf32>
    %212 = vector.shape_cast %211 : vector<1x8x128xf32> to vector<8x128xf32>
    %cst_56 = arith.constant dense<0.000000e+00> : vector<8x128xf32>
    %213 = tpu.matmul %205, %3, %cst_56 {dimension_numbers = #tpu.dot_dimension_numbers<[1], [0], [0], [1], [0, 0, 1, 1], [], []>} : vector<8x32xf32>, vector<32x128xf32>, vector<8x128xf32> -> vector<8x128xf32>
    %214 = arith.addf %212, %213 : vector<8x128xf32>
    %215 = vector.extract_strided_slice %214 {offsets = [0, 0], sizes = [8, 32], strides = [1, 1]} : vector<8x128xf32> to vector<8x32xf32>
    %216 = arith.negf %215 : vector<8x32xf32>
    %217 = math.exp %216 : vector<8x32xf32>
    %cst_57 = arith.constant 1.000000e+00 : f32
    %218 = vector.broadcast %cst_57 : f32 to vector<8x32xf32>
    %219 = arith.addf %218, %217 : vector<8x32xf32>
    %220 = arith.divf %218, %219 : vector<8x32xf32>
    %221 = vector.extract_strided_slice %214 {offsets = [0, 32], sizes = [8, 32], strides = [1, 1]} : vector<8x128xf32> to vector<8x32xf32>
    %222 = arith.negf %221 : vector<8x32xf32>
    %223 = math.exp %222 : vector<8x32xf32>
    %cst_58 = arith.constant 1.000000e+00 : f32
    %224 = vector.broadcast %cst_58 : f32 to vector<8x32xf32>
    %225 = arith.addf %224, %223 : vector<8x32xf32>
    %226 = arith.divf %224, %225 : vector<8x32xf32>
    %227 = vector.extract_strided_slice %214 {offsets = [0, 64], sizes = [8, 32], strides = [1, 1]} : vector<8x128xf32> to vector<8x32xf32>
    %228 = math.tanh %227 : vector<8x32xf32>
    %229 = vector.extract_strided_slice %214 {offsets = [0, 96], sizes = [8, 32], strides = [1, 1]} : vector<8x128xf32> to vector<8x32xf32>
    %230 = arith.negf %229 : vector<8x32xf32>
    %231 = math.exp %230 : vector<8x32xf32>
    %cst_59 = arith.constant 1.000000e+00 : f32
    %232 = vector.broadcast %cst_59 : f32 to vector<8x32xf32>
    %233 = arith.addf %232, %231 : vector<8x32xf32>
    %234 = arith.divf %232, %233 : vector<8x32xf32>
    %235 = arith.mulf %226, %203 : vector<8x32xf32>
    %236 = arith.mulf %220, %228 : vector<8x32xf32>
    %237 = arith.addf %235, %236 : vector<8x32xf32>
    %238 = math.tanh %237 : vector<8x32xf32>
    %239 = arith.mulf %234, %238 : vector<8x32xf32>
    %240 = arith.index_cast %c6_i32 : i32 to index
    %c0_60 = arith.constant 0 : index
    %c0_61 = arith.constant 0 : index
    %241 = vector.load %arg5[%240, %c0_60, %c0_61] : memref<16x8x32xf32, #tpu.memory_space<vmem>>, vector<1x8x32xf32>
    %242 = vector.shape_cast %241 : vector<1x8x32xf32> to vector<8x32xf32>
    %243 = vector.shape_cast %239 : vector<8x32xf32> to vector<1x8x32xf32>
    tpu.vector_store %arg5[%240, %c0_60, %c0_61], %243 {strides = array<i32>} : memref<16x8x32xf32, #tpu.memory_space<vmem>>, vector<1x8x32xf32>,
    %c7_i32 = arith.constant 7 : i32
    %244 = arith.index_cast %c7_i32 : i32 to index
    %c0_62 = arith.constant 0 : index
    %c0_63 = arith.constant 0 : index
    %245 = vector.load %arg1[%244, %c0_62, %c0_63] : memref<16x8x128xf32, #tpu.memory_space<vmem>>, vector<1x8x128xf32>
    %246 = vector.shape_cast %245 : vector<1x8x128xf32> to vector<8x128xf32>
    %cst_64 = arith.constant dense<0.000000e+00> : vector<8x128xf32>
    %247 = tpu.matmul %239, %3, %cst_64 {dimension_numbers = #tpu.dot_dimension_numbers<[1], [0], [0], [1], [0, 0, 1, 1], [], []>} : vector<8x32xf32>, vector<32x128xf32>, vector<8x128xf32> -> vector<8x128xf32>
    %248 = arith.addf %246, %247 : vector<8x128xf32>
    %249 = vector.extract_strided_slice %248 {offsets = [0, 0], sizes = [8, 32], strides = [1, 1]} : vector<8x128xf32> to vector<8x32xf32>
    %250 = arith.negf %249 : vector<8x32xf32>
    %251 = math.exp %250 : vector<8x32xf32>
    %cst_65 = arith.constant 1.000000e+00 : f32
    %252 = vector.broadcast %cst_65 : f32 to vector<8x32xf32>
    %253 = arith.addf %252, %251 : vector<8x32xf32>
    %254 = arith.divf %252, %253 : vector<8x32xf32>
    %255 = vector.extract_strided_slice %248 {offsets = [0, 32], sizes = [8, 32], strides = [1, 1]} : vector<8x128xf32> to vector<8x32xf32>
    %256 = arith.negf %255 : vector<8x32xf32>
    %257 = math.exp %256 : vector<8x32xf32>
    %cst_66 = arith.constant 1.000000e+00 : f32
    %258 = vector.broadcast %cst_66 : f32 to vector<8x32xf32>
    %259 = arith.addf %258, %257 : vector<8x32xf32>
    %260 = arith.divf %258, %259 : vector<8x32xf32>
    %261 = vector.extract_strided_slice %248 {offsets = [0, 64], sizes = [8, 32], strides = [1, 1]} : vector<8x128xf32> to vector<8x32xf32>
    %262 = math.tanh %261 : vector<8x32xf32>
    %263 = vector.extract_strided_slice %248 {offsets = [0, 96], sizes = [8, 32], strides = [1, 1]} : vector<8x128xf32> to vector<8x32xf32>
    %264 = arith.negf %263 : vector<8x32xf32>
    %265 = math.exp %264 : vector<8x32xf32>
    %cst_67 = arith.constant 1.000000e+00 : f32
    %266 = vector.broadcast %cst_67 : f32 to vector<8x32xf32>
    %267 = arith.addf %266, %265 : vector<8x32xf32>
    %268 = arith.divf %266, %267 : vector<8x32xf32>
    %269 = arith.mulf %260, %237 : vector<8x32xf32>
    %270 = arith.mulf %254, %262 : vector<8x32xf32>
    %271 = arith.addf %269, %270 : vector<8x32xf32>
    %272 = math.tanh %271 : vector<8x32xf32>
    %273 = arith.mulf %268, %272 : vector<8x32xf32>
    %274 = arith.index_cast %c7_i32 : i32 to index
    %c0_68 = arith.constant 0 : index
    %c0_69 = arith.constant 0 : index
    %275 = vector.load %arg5[%274, %c0_68, %c0_69] : memref<16x8x32xf32, #tpu.memory_space<vmem>>, vector<1x8x32xf32>
    %276 = vector.shape_cast %275 : vector<1x8x32xf32> to vector<8x32xf32>
    %277 = vector.shape_cast %273 : vector<8x32xf32> to vector<1x8x32xf32>
    tpu.vector_store %arg5[%274, %c0_68, %c0_69], %277 {strides = array<i32>} : memref<16x8x32xf32, #tpu.memory_space<vmem>>, vector<1x8x32xf32>,
    %c8_i32 = arith.constant 8 : i32
    %278 = arith.index_cast %c8_i32 : i32 to index
    %c0_70 = arith.constant 0 : index
    %c0_71 = arith.constant 0 : index
    %279 = vector.load %arg1[%278, %c0_70, %c0_71] : memref<16x8x128xf32, #tpu.memory_space<vmem>>, vector<1x8x128xf32>
    %280 = vector.shape_cast %279 : vector<1x8x128xf32> to vector<8x128xf32>
    %cst_72 = arith.constant dense<0.000000e+00> : vector<8x128xf32>
    %281 = tpu.matmul %273, %3, %cst_72 {dimension_numbers = #tpu.dot_dimension_numbers<[1], [0], [0], [1], [0, 0, 1, 1], [], []>} : vector<8x32xf32>, vector<32x128xf32>, vector<8x128xf32> -> vector<8x128xf32>
    %282 = arith.addf %280, %281 : vector<8x128xf32>
    %283 = vector.extract_strided_slice %282 {offsets = [0, 0], sizes = [8, 32], strides = [1, 1]} : vector<8x128xf32> to vector<8x32xf32>
    %284 = arith.negf %283 : vector<8x32xf32>
    %285 = math.exp %284 : vector<8x32xf32>
    %cst_73 = arith.constant 1.000000e+00 : f32
    %286 = vector.broadcast %cst_73 : f32 to vector<8x32xf32>
    %287 = arith.addf %286, %285 : vector<8x32xf32>
    %288 = arith.divf %286, %287 : vector<8x32xf32>
    %289 = vector.extract_strided_slice %282 {offsets = [0, 32], sizes = [8, 32], strides = [1, 1]} : vector<8x128xf32> to vector<8x32xf32>
    %290 = arith.negf %289 : vector<8x32xf32>
    %291 = math.exp %290 : vector<8x32xf32>
    %cst_74 = arith.constant 1.000000e+00 : f32
    %292 = vector.broadcast %cst_74 : f32 to vector<8x32xf32>
    %293 = arith.addf %292, %291 : vector<8x32xf32>
    %294 = arith.divf %292, %293 : vector<8x32xf32>
    %295 = vector.extract_strided_slice %282 {offsets = [0, 64], sizes = [8, 32], strides = [1, 1]} : vector<8x128xf32> to vector<8x32xf32>
    %296 = math.tanh %295 : vector<8x32xf32>
    %297 = vector.extract_strided_slice %282 {offsets = [0, 96], sizes = [8, 32], strides = [1, 1]} : vector<8x128xf32> to vector<8x32xf32>
    %298 = arith.negf %297 : vector<8x32xf32>
    %299 = math.exp %298 : vector<8x32xf32>
    %cst_75 = arith.constant 1.000000e+00 : f32
    %300 = vector.broadcast %cst_75 : f32 to vector<8x32xf32>
    %301 = arith.addf %300, %299 : vector<8x32xf32>
    %302 = arith.divf %300, %301 : vector<8x32xf32>
    %303 = arith.mulf %294, %271 : vector<8x32xf32>
    %304 = arith.mulf %288, %296 : vector<8x32xf32>
    %305 = arith.addf %303, %304 : vector<8x32xf32>
    %306 = math.tanh %305 : vector<8x32xf32>
    %307 = arith.mulf %302, %306 : vector<8x32xf32>
    %308 = arith.index_cast %c8_i32 : i32 to index
    %c0_76 = arith.constant 0 : index
    %c0_77 = arith.constant 0 : index
    %309 = vector.load %arg5[%308, %c0_76, %c0_77] : memref<16x8x32xf32, #tpu.memory_space<vmem>>, vector<1x8x32xf32>
    %310 = vector.shape_cast %309 : vector<1x8x32xf32> to vector<8x32xf32>
    %311 = vector.shape_cast %307 : vector<8x32xf32> to vector<1x8x32xf32>
    tpu.vector_store %arg5[%308, %c0_76, %c0_77], %311 {strides = array<i32>} : memref<16x8x32xf32, #tpu.memory_space<vmem>>, vector<1x8x32xf32>,
    %c9_i32 = arith.constant 9 : i32
    %312 = arith.index_cast %c9_i32 : i32 to index
    %c0_78 = arith.constant 0 : index
    %c0_79 = arith.constant 0 : index
    %313 = vector.load %arg1[%312, %c0_78, %c0_79] : memref<16x8x128xf32, #tpu.memory_space<vmem>>, vector<1x8x128xf32>
    %314 = vector.shape_cast %313 : vector<1x8x128xf32> to vector<8x128xf32>
    %cst_80 = arith.constant dense<0.000000e+00> : vector<8x128xf32>
    %315 = tpu.matmul %307, %3, %cst_80 {dimension_numbers = #tpu.dot_dimension_numbers<[1], [0], [0], [1], [0, 0, 1, 1], [], []>} : vector<8x32xf32>, vector<32x128xf32>, vector<8x128xf32> -> vector<8x128xf32>
    %316 = arith.addf %314, %315 : vector<8x128xf32>
    %317 = vector.extract_strided_slice %316 {offsets = [0, 0], sizes = [8, 32], strides = [1, 1]} : vector<8x128xf32> to vector<8x32xf32>
    %318 = arith.negf %317 : vector<8x32xf32>
    %319 = math.exp %318 : vector<8x32xf32>
    %cst_81 = arith.constant 1.000000e+00 : f32
    %320 = vector.broadcast %cst_81 : f32 to vector<8x32xf32>
    %321 = arith.addf %320, %319 : vector<8x32xf32>
    %322 = arith.divf %320, %321 : vector<8x32xf32>
    %323 = vector.extract_strided_slice %316 {offsets = [0, 32], sizes = [8, 32], strides = [1, 1]} : vector<8x128xf32> to vector<8x32xf32>
    %324 = arith.negf %323 : vector<8x32xf32>
    %325 = math.exp %324 : vector<8x32xf32>
    %cst_82 = arith.constant 1.000000e+00 : f32
    %326 = vector.broadcast %cst_82 : f32 to vector<8x32xf32>
    %327 = arith.addf %326, %325 : vector<8x32xf32>
    %328 = arith.divf %326, %327 : vector<8x32xf32>
    %329 = vector.extract_strided_slice %316 {offsets = [0, 64], sizes = [8, 32], strides = [1, 1]} : vector<8x128xf32> to vector<8x32xf32>
    %330 = math.tanh %329 : vector<8x32xf32>
    %331 = vector.extract_strided_slice %316 {offsets = [0, 96], sizes = [8, 32], strides = [1, 1]} : vector<8x128xf32> to vector<8x32xf32>
    %332 = arith.negf %331 : vector<8x32xf32>
    %333 = math.exp %332 : vector<8x32xf32>
    %cst_83 = arith.constant 1.000000e+00 : f32
    %334 = vector.broadcast %cst_83 : f32 to vector<8x32xf32>
    %335 = arith.addf %334, %333 : vector<8x32xf32>
    %336 = arith.divf %334, %335 : vector<8x32xf32>
    %337 = arith.mulf %328, %305 : vector<8x32xf32>
    %338 = arith.mulf %322, %330 : vector<8x32xf32>
    %339 = arith.addf %337, %338 : vector<8x32xf32>
    %340 = math.tanh %339 : vector<8x32xf32>
    %341 = arith.mulf %336, %340 : vector<8x32xf32>
    %342 = arith.index_cast %c9_i32 : i32 to index
    %c0_84 = arith.constant 0 : index
    %c0_85 = arith.constant 0 : index
    %343 = vector.load %arg5[%342, %c0_84, %c0_85] : memref<16x8x32xf32, #tpu.memory_space<vmem>>, vector<1x8x32xf32>
    %344 = vector.shape_cast %343 : vector<1x8x32xf32> to vector<8x32xf32>
    %345 = vector.shape_cast %341 : vector<8x32xf32> to vector<1x8x32xf32>
    tpu.vector_store %arg5[%342, %c0_84, %c0_85], %345 {strides = array<i32>} : memref<16x8x32xf32, #tpu.memory_space<vmem>>, vector<1x8x32xf32>,
    %c10_i32 = arith.constant 10 : i32
    %346 = arith.index_cast %c10_i32 : i32 to index
    %c0_86 = arith.constant 0 : index
    %c0_87 = arith.constant 0 : index
    %347 = vector.load %arg1[%346, %c0_86, %c0_87] : memref<16x8x128xf32, #tpu.memory_space<vmem>>, vector<1x8x128xf32>
    %348 = vector.shape_cast %347 : vector<1x8x128xf32> to vector<8x128xf32>
    %cst_88 = arith.constant dense<0.000000e+00> : vector<8x128xf32>
    %349 = tpu.matmul %341, %3, %cst_88 {dimension_numbers = #tpu.dot_dimension_numbers<[1], [0], [0], [1], [0, 0, 1, 1], [], []>} : vector<8x32xf32>, vector<32x128xf32>, vector<8x128xf32> -> vector<8x128xf32>
    %350 = arith.addf %348, %349 : vector<8x128xf32>
    %351 = vector.extract_strided_slice %350 {offsets = [0, 0], sizes = [8, 32], strides = [1, 1]} : vector<8x128xf32> to vector<8x32xf32>
    %352 = arith.negf %351 : vector<8x32xf32>
    %353 = math.exp %352 : vector<8x32xf32>
    %cst_89 = arith.constant 1.000000e+00 : f32
    %354 = vector.broadcast %cst_89 : f32 to vector<8x32xf32>
    %355 = arith.addf %354, %353 : vector<8x32xf32>
    %356 = arith.divf %354, %355 : vector<8x32xf32>
    %357 = vector.extract_strided_slice %350 {offsets = [0, 32], sizes = [8, 32], strides = [1, 1]} : vector<8x128xf32> to vector<8x32xf32>
    %358 = arith.negf %357 : vector<8x32xf32>
    %359 = math.exp %358 : vector<8x32xf32>
    %cst_90 = arith.constant 1.000000e+00 : f32
    %360 = vector.broadcast %cst_90 : f32 to vector<8x32xf32>
    %361 = arith.addf %360, %359 : vector<8x32xf32>
    %362 = arith.divf %360, %361 : vector<8x32xf32>
    %363 = vector.extract_strided_slice %350 {offsets = [0, 64], sizes = [8, 32], strides = [1, 1]} : vector<8x128xf32> to vector<8x32xf32>
    %364 = math.tanh %363 : vector<8x32xf32>
    %365 = vector.extract_strided_slice %350 {offsets = [0, 96], sizes = [8, 32], strides = [1, 1]} : vector<8x128xf32> to vector<8x32xf32>
    %366 = arith.negf %365 : vector<8x32xf32>
    %367 = math.exp %366 : vector<8x32xf32>
    %cst_91 = arith.constant 1.000000e+00 : f32
    %368 = vector.broadcast %cst_91 : f32 to vector<8x32xf32>
    %369 = arith.addf %368, %367 : vector<8x32xf32>
    %370 = arith.divf %368, %369 : vector<8x32xf32>
    %371 = arith.mulf %362, %339 : vector<8x32xf32>
    %372 = arith.mulf %356, %364 : vector<8x32xf32>
    %373 = arith.addf %371, %372 : vector<8x32xf32>
    %374 = math.tanh %373 : vector<8x32xf32>
    %375 = arith.mulf %370, %374 : vector<8x32xf32>
    %376 = arith.index_cast %c10_i32 : i32 to index
    %c0_92 = arith.constant 0 : index
    %c0_93 = arith.constant 0 : index
    %377 = vector.load %arg5[%376, %c0_92, %c0_93] : memref<16x8x32xf32, #tpu.memory_space<vmem>>, vector<1x8x32xf32>
    %378 = vector.shape_cast %377 : vector<1x8x32xf32> to vector<8x32xf32>
    %379 = vector.shape_cast %375 : vector<8x32xf32> to vector<1x8x32xf32>
    tpu.vector_store %arg5[%376, %c0_92, %c0_93], %379 {strides = array<i32>} : memref<16x8x32xf32, #tpu.memory_space<vmem>>, vector<1x8x32xf32>,
    %c11_i32 = arith.constant 11 : i32
    %380 = arith.index_cast %c11_i32 : i32 to index
    %c0_94 = arith.constant 0 : index
    %c0_95 = arith.constant 0 : index
    %381 = vector.load %arg1[%380, %c0_94, %c0_95] : memref<16x8x128xf32, #tpu.memory_space<vmem>>, vector<1x8x128xf32>
    %382 = vector.shape_cast %381 : vector<1x8x128xf32> to vector<8x128xf32>
    %cst_96 = arith.constant dense<0.000000e+00> : vector<8x128xf32>
    %383 = tpu.matmul %375, %3, %cst_96 {dimension_numbers = #tpu.dot_dimension_numbers<[1], [0], [0], [1], [0, 0, 1, 1], [], []>} : vector<8x32xf32>, vector<32x128xf32>, vector<8x128xf32> -> vector<8x128xf32>
    %384 = arith.addf %382, %383 : vector<8x128xf32>
    %385 = vector.extract_strided_slice %384 {offsets = [0, 0], sizes = [8, 32], strides = [1, 1]} : vector<8x128xf32> to vector<8x32xf32>
    %386 = arith.negf %385 : vector<8x32xf32>
    %387 = math.exp %386 : vector<8x32xf32>
    %cst_97 = arith.constant 1.000000e+00 : f32
    %388 = vector.broadcast %cst_97 : f32 to vector<8x32xf32>
    %389 = arith.addf %388, %387 : vector<8x32xf32>
    %390 = arith.divf %388, %389 : vector<8x32xf32>
    %391 = vector.extract_strided_slice %384 {offsets = [0, 32], sizes = [8, 32], strides = [1, 1]} : vector<8x128xf32> to vector<8x32xf32>
    %392 = arith.negf %391 : vector<8x32xf32>
    %393 = math.exp %392 : vector<8x32xf32>
    %cst_98 = arith.constant 1.000000e+00 : f32
    %394 = vector.broadcast %cst_98 : f32 to vector<8x32xf32>
    %395 = arith.addf %394, %393 : vector<8x32xf32>
    %396 = arith.divf %394, %395 : vector<8x32xf32>
    %397 = vector.extract_strided_slice %384 {offsets = [0, 64], sizes = [8, 32], strides = [1, 1]} : vector<8x128xf32> to vector<8x32xf32>
    %398 = math.tanh %397 : vector<8x32xf32>
    %399 = vector.extract_strided_slice %384 {offsets = [0, 96], sizes = [8, 32], strides = [1, 1]} : vector<8x128xf32> to vector<8x32xf32>
    %400 = arith.negf %399 : vector<8x32xf32>
    %401 = math.exp %400 : vector<8x32xf32>
    %cst_99 = arith.constant 1.000000e+00 : f32
    %402 = vector.broadcast %cst_99 : f32 to vector<8x32xf32>
    %403 = arith.addf %402, %401 : vector<8x32xf32>
    %404 = arith.divf %402, %403 : vector<8x32xf32>
    %405 = arith.mulf %396, %373 : vector<8x32xf32>
    %406 = arith.mulf %390, %398 : vector<8x32xf32>
    %407 = arith.addf %405, %406 : vector<8x32xf32>
    %408 = math.tanh %407 : vector<8x32xf32>
    %409 = arith.mulf %404, %408 : vector<8x32xf32>
    %410 = arith.index_cast %c11_i32 : i32 to index
    %c0_100 = arith.constant 0 : index
    %c0_101 = arith.constant 0 : index
    %411 = vector.load %arg5[%410, %c0_100, %c0_101] : memref<16x8x32xf32, #tpu.memory_space<vmem>>, vector<1x8x32xf32>
    %412 = vector.shape_cast %411 : vector<1x8x32xf32> to vector<8x32xf32>
    %413 = vector.shape_cast %409 : vector<8x32xf32> to vector<1x8x32xf32>
    tpu.vector_store %arg5[%410, %c0_100, %c0_101], %413 {strides = array<i32>} : memref<16x8x32xf32, #tpu.memory_space<vmem>>, vector<1x8x32xf32>,
    %c12_i32 = arith.constant 12 : i32
    %414 = arith.index_cast %c12_i32 : i32 to index
    %c0_102 = arith.constant 0 : index
    %c0_103 = arith.constant 0 : index
    %415 = vector.load %arg1[%414, %c0_102, %c0_103] : memref<16x8x128xf32, #tpu.memory_space<vmem>>, vector<1x8x128xf32>
    %416 = vector.shape_cast %415 : vector<1x8x128xf32> to vector<8x128xf32>
    %cst_104 = arith.constant dense<0.000000e+00> : vector<8x128xf32>
    %417 = tpu.matmul %409, %3, %cst_104 {dimension_numbers = #tpu.dot_dimension_numbers<[1], [0], [0], [1], [0, 0, 1, 1], [], []>} : vector<8x32xf32>, vector<32x128xf32>, vector<8x128xf32> -> vector<8x128xf32>
    %418 = arith.addf %416, %417 : vector<8x128xf32>
    %419 = vector.extract_strided_slice %418 {offsets = [0, 0], sizes = [8, 32], strides = [1, 1]} : vector<8x128xf32> to vector<8x32xf32>
    %420 = arith.negf %419 : vector<8x32xf32>
    %421 = math.exp %420 : vector<8x32xf32>
    %cst_105 = arith.constant 1.000000e+00 : f32
    %422 = vector.broadcast %cst_105 : f32 to vector<8x32xf32>
    %423 = arith.addf %422, %421 : vector<8x32xf32>
    %424 = arith.divf %422, %423 : vector<8x32xf32>
    %425 = vector.extract_strided_slice %418 {offsets = [0, 32], sizes = [8, 32], strides = [1, 1]} : vector<8x128xf32> to vector<8x32xf32>
    %426 = arith.negf %425 : vector<8x32xf32>
    %427 = math.exp %426 : vector<8x32xf32>
    %cst_106 = arith.constant 1.000000e+00 : f32
    %428 = vector.broadcast %cst_106 : f32 to vector<8x32xf32>
    %429 = arith.addf %428, %427 : vector<8x32xf32>
    %430 = arith.divf %428, %429 : vector<8x32xf32>
    %431 = vector.extract_strided_slice %418 {offsets = [0, 64], sizes = [8, 32], strides = [1, 1]} : vector<8x128xf32> to vector<8x32xf32>
    %432 = math.tanh %431 : vector<8x32xf32>
    %433 = vector.extract_strided_slice %418 {offsets = [0, 96], sizes = [8, 32], strides = [1, 1]} : vector<8x128xf32> to vector<8x32xf32>
    %434 = arith.negf %433 : vector<8x32xf32>
    %435 = math.exp %434 : vector<8x32xf32>
    %cst_107 = arith.constant 1.000000e+00 : f32
    %436 = vector.broadcast %cst_107 : f32 to vector<8x32xf32>
    %437 = arith.addf %436, %435 : vector<8x32xf32>
    %438 = arith.divf %436, %437 : vector<8x32xf32>
    %439 = arith.mulf %430, %407 : vector<8x32xf32>
    %440 = arith.mulf %424, %432 : vector<8x32xf32>
    %441 = arith.addf %439, %440 : vector<8x32xf32>
    %442 = math.tanh %441 : vector<8x32xf32>
    %443 = arith.mulf %438, %442 : vector<8x32xf32>
    %444 = arith.index_cast %c12_i32 : i32 to index
    %c0_108 = arith.constant 0 : index
    %c0_109 = arith.constant 0 : index
    %445 = vector.load %arg5[%444, %c0_108, %c0_109] : memref<16x8x32xf32, #tpu.memory_space<vmem>>, vector<1x8x32xf32>
    %446 = vector.shape_cast %445 : vector<1x8x32xf32> to vector<8x32xf32>
    %447 = vector.shape_cast %443 : vector<8x32xf32> to vector<1x8x32xf32>
    tpu.vector_store %arg5[%444, %c0_108, %c0_109], %447 {strides = array<i32>} : memref<16x8x32xf32, #tpu.memory_space<vmem>>, vector<1x8x32xf32>,
    %c13_i32 = arith.constant 13 : i32
    %448 = arith.index_cast %c13_i32 : i32 to index
    %c0_110 = arith.constant 0 : index
    %c0_111 = arith.constant 0 : index
    %449 = vector.load %arg1[%448, %c0_110, %c0_111] : memref<16x8x128xf32, #tpu.memory_space<vmem>>, vector<1x8x128xf32>
    %450 = vector.shape_cast %449 : vector<1x8x128xf32> to vector<8x128xf32>
    %cst_112 = arith.constant dense<0.000000e+00> : vector<8x128xf32>
    %451 = tpu.matmul %443, %3, %cst_112 {dimension_numbers = #tpu.dot_dimension_numbers<[1], [0], [0], [1], [0, 0, 1, 1], [], []>} : vector<8x32xf32>, vector<32x128xf32>, vector<8x128xf32> -> vector<8x128xf32>
    %452 = arith.addf %450, %451 : vector<8x128xf32>
    %453 = vector.extract_strided_slice %452 {offsets = [0, 0], sizes = [8, 32], strides = [1, 1]} : vector<8x128xf32> to vector<8x32xf32>
    %454 = arith.negf %453 : vector<8x32xf32>
    %455 = math.exp %454 : vector<8x32xf32>
    %cst_113 = arith.constant 1.000000e+00 : f32
    %456 = vector.broadcast %cst_113 : f32 to vector<8x32xf32>
    %457 = arith.addf %456, %455 : vector<8x32xf32>
    %458 = arith.divf %456, %457 : vector<8x32xf32>
    %459 = vector.extract_strided_slice %452 {offsets = [0, 32], sizes = [8, 32], strides = [1, 1]} : vector<8x128xf32> to vector<8x32xf32>
    %460 = arith.negf %459 : vector<8x32xf32>
    %461 = math.exp %460 : vector<8x32xf32>
    %cst_114 = arith.constant 1.000000e+00 : f32
    %462 = vector.broadcast %cst_114 : f32 to vector<8x32xf32>
    %463 = arith.addf %462, %461 : vector<8x32xf32>
    %464 = arith.divf %462, %463 : vector<8x32xf32>
    %465 = vector.extract_strided_slice %452 {offsets = [0, 64], sizes = [8, 32], strides = [1, 1]} : vector<8x128xf32> to vector<8x32xf32>
    %466 = math.tanh %465 : vector<8x32xf32>
    %467 = vector.extract_strided_slice %452 {offsets = [0, 96], sizes = [8, 32], strides = [1, 1]} : vector<8x128xf32> to vector<8x32xf32>
    %468 = arith.negf %467 : vector<8x32xf32>
    %469 = math.exp %468 : vector<8x32xf32>
    %cst_115 = arith.constant 1.000000e+00 : f32
    %470 = vector.broadcast %cst_115 : f32 to vector<8x32xf32>
    %471 = arith.addf %470, %469 : vector<8x32xf32>
    %472 = arith.divf %470, %471 : vector<8x32xf32>
    %473 = arith.mulf %464, %441 : vector<8x32xf32>
    %474 = arith.mulf %458, %466 : vector<8x32xf32>
    %475 = arith.addf %473, %474 : vector<8x32xf32>
    %476 = math.tanh %475 : vector<8x32xf32>
    %477 = arith.mulf %472, %476 : vector<8x32xf32>
    %478 = arith.index_cast %c13_i32 : i32 to index
    %c0_116 = arith.constant 0 : index
    %c0_117 = arith.constant 0 : index
    %479 = vector.load %arg5[%478, %c0_116, %c0_117] : memref<16x8x32xf32, #tpu.memory_space<vmem>>, vector<1x8x32xf32>
    %480 = vector.shape_cast %479 : vector<1x8x32xf32> to vector<8x32xf32>
    %481 = vector.shape_cast %477 : vector<8x32xf32> to vector<1x8x32xf32>
    tpu.vector_store %arg5[%478, %c0_116, %c0_117], %481 {strides = array<i32>} : memref<16x8x32xf32, #tpu.memory_space<vmem>>, vector<1x8x32xf32>,
    %c14_i32 = arith.constant 14 : i32
    %482 = arith.index_cast %c14_i32 : i32 to index
    %c0_118 = arith.constant 0 : index
    %c0_119 = arith.constant 0 : index
    %483 = vector.load %arg1[%482, %c0_118, %c0_119] : memref<16x8x128xf32, #tpu.memory_space<vmem>>, vector<1x8x128xf32>
    %484 = vector.shape_cast %483 : vector<1x8x128xf32> to vector<8x128xf32>
    %cst_120 = arith.constant dense<0.000000e+00> : vector<8x128xf32>
    %485 = tpu.matmul %477, %3, %cst_120 {dimension_numbers = #tpu.dot_dimension_numbers<[1], [0], [0], [1], [0, 0, 1, 1], [], []>} : vector<8x32xf32>, vector<32x128xf32>, vector<8x128xf32> -> vector<8x128xf32>
    %486 = arith.addf %484, %485 : vector<8x128xf32>
    %487 = vector.extract_strided_slice %486 {offsets = [0, 0], sizes = [8, 32], strides = [1, 1]} : vector<8x128xf32> to vector<8x32xf32>
    %488 = arith.negf %487 : vector<8x32xf32>
    %489 = math.exp %488 : vector<8x32xf32>
    %cst_121 = arith.constant 1.000000e+00 : f32
    %490 = vector.broadcast %cst_121 : f32 to vector<8x32xf32>
    %491 = arith.addf %490, %489 : vector<8x32xf32>
    %492 = arith.divf %490, %491 : vector<8x32xf32>
    %493 = vector.extract_strided_slice %486 {offsets = [0, 32], sizes = [8, 32], strides = [1, 1]} : vector<8x128xf32> to vector<8x32xf32>
    %494 = arith.negf %493 : vector<8x32xf32>
    %495 = math.exp %494 : vector<8x32xf32>
    %cst_122 = arith.constant 1.000000e+00 : f32
    %496 = vector.broadcast %cst_122 : f32 to vector<8x32xf32>
    %497 = arith.addf %496, %495 : vector<8x32xf32>
    %498 = arith.divf %496, %497 : vector<8x32xf32>
    %499 = vector.extract_strided_slice %486 {offsets = [0, 64], sizes = [8, 32], strides = [1, 1]} : vector<8x128xf32> to vector<8x32xf32>
    %500 = math.tanh %499 : vector<8x32xf32>
    %501 = vector.extract_strided_slice %486 {offsets = [0, 96], sizes = [8, 32], strides = [1, 1]} : vector<8x128xf32> to vector<8x32xf32>
    %502 = arith.negf %501 : vector<8x32xf32>
    %503 = math.exp %502 : vector<8x32xf32>
    %cst_123 = arith.constant 1.000000e+00 : f32
    %504 = vector.broadcast %cst_123 : f32 to vector<8x32xf32>
    %505 = arith.addf %504, %503 : vector<8x32xf32>
    %506 = arith.divf %504, %505 : vector<8x32xf32>
    %507 = arith.mulf %498, %475 : vector<8x32xf32>
    %508 = arith.mulf %492, %500 : vector<8x32xf32>
    %509 = arith.addf %507, %508 : vector<8x32xf32>
    %510 = math.tanh %509 : vector<8x32xf32>
    %511 = arith.mulf %506, %510 : vector<8x32xf32>
    %512 = arith.index_cast %c14_i32 : i32 to index
    %c0_124 = arith.constant 0 : index
    %c0_125 = arith.constant 0 : index
    %513 = vector.load %arg5[%512, %c0_124, %c0_125] : memref<16x8x32xf32, #tpu.memory_space<vmem>>, vector<1x8x32xf32>
    %514 = vector.shape_cast %513 : vector<1x8x32xf32> to vector<8x32xf32>
    %515 = vector.shape_cast %511 : vector<8x32xf32> to vector<1x8x32xf32>
    tpu.vector_store %arg5[%512, %c0_124, %c0_125], %515 {strides = array<i32>} : memref<16x8x32xf32, #tpu.memory_space<vmem>>, vector<1x8x32xf32>,
    %c15_i32 = arith.constant 15 : i32
    %516 = arith.index_cast %c15_i32 : i32 to index
    %c0_126 = arith.constant 0 : index
    %c0_127 = arith.constant 0 : index
    %517 = vector.load %arg1[%516, %c0_126, %c0_127] : memref<16x8x128xf32, #tpu.memory_space<vmem>>, vector<1x8x128xf32>
    %518 = vector.shape_cast %517 : vector<1x8x128xf32> to vector<8x128xf32>
    %cst_128 = arith.constant dense<0.000000e+00> : vector<8x128xf32>
    %519 = tpu.matmul %511, %3, %cst_128 {dimension_numbers = #tpu.dot_dimension_numbers<[1], [0], [0], [1], [0, 0, 1, 1], [], []>} : vector<8x32xf32>, vector<32x128xf32>, vector<8x128xf32> -> vector<8x128xf32>
    %520 = arith.addf %518, %519 : vector<8x128xf32>
    %521 = vector.extract_strided_slice %520 {offsets = [0, 0], sizes = [8, 32], strides = [1, 1]} : vector<8x128xf32> to vector<8x32xf32>
    %522 = arith.negf %521 : vector<8x32xf32>
    %523 = math.exp %522 : vector<8x32xf32>
    %cst_129 = arith.constant 1.000000e+00 : f32
    %524 = vector.broadcast %cst_129 : f32 to vector<8x32xf32>
    %525 = arith.addf %524, %523 : vector<8x32xf32>
    %526 = arith.divf %524, %525 : vector<8x32xf32>
    %527 = vector.extract_strided_slice %520 {offsets = [0, 32], sizes = [8, 32], strides = [1, 1]} : vector<8x128xf32> to vector<8x32xf32>
    %528 = arith.negf %527 : vector<8x32xf32>
    %529 = math.exp %528 : vector<8x32xf32>
    %cst_130 = arith.constant 1.000000e+00 : f32
    %530 = vector.broadcast %cst_130 : f32 to vector<8x32xf32>
    %531 = arith.addf %530, %529 : vector<8x32xf32>
    %532 = arith.divf %530, %531 : vector<8x32xf32>
    %533 = vector.extract_strided_slice %520 {offsets = [0, 64], sizes = [8, 32], strides = [1, 1]} : vector<8x128xf32> to vector<8x32xf32>
    %534 = math.tanh %533 : vector<8x32xf32>
    %535 = vector.extract_strided_slice %520 {offsets = [0, 96], sizes = [8, 32], strides = [1, 1]} : vector<8x128xf32> to vector<8x32xf32>
    %536 = arith.negf %535 : vector<8x32xf32>
    %537 = math.exp %536 : vector<8x32xf32>
    %cst_131 = arith.constant 1.000000e+00 : f32
    %538 = vector.broadcast %cst_131 : f32 to vector<8x32xf32>
    %539 = arith.addf %538, %537 : vector<8x32xf32>
    %540 = arith.divf %538, %539 : vector<8x32xf32>
    %541 = arith.mulf %532, %509 : vector<8x32xf32>
    %542 = arith.mulf %526, %534 : vector<8x32xf32>
    %543 = arith.addf %541, %542 : vector<8x32xf32>
    %544 = math.tanh %543 : vector<8x32xf32>
    %545 = arith.mulf %540, %544 : vector<8x32xf32>
    %546 = arith.index_cast %c15_i32 : i32 to index
    %c0_132 = arith.constant 0 : index
    %c0_133 = arith.constant 0 : index
    %547 = vector.load %arg5[%546, %c0_132, %c0_133] : memref<16x8x32xf32, #tpu.memory_space<vmem>>, vector<1x8x32xf32>
    %548 = vector.shape_cast %547 : vector<1x8x32xf32> to vector<8x32xf32>
    %549 = vector.shape_cast %545 : vector<8x32xf32> to vector<1x8x32xf32>
    tpu.vector_store %arg5[%546, %c0_132, %c0_133], %549 {strides = array<i32>} : memref<16x8x32xf32, #tpu.memory_space<vmem>>, vector<1x8x32xf32>,
    %c16_i32 = arith.constant 16 : i32
    %c0_134 = arith.constant 0 : index
    %c0_135 = arith.constant 0 : index
    %550 = vector.load %arg6[%c0_134, %c0_135] : memref<8x32xf32, #tpu.memory_space<vmem>>, vector<8x32xf32>
    tpu.vector_store %arg6[%c0_134, %c0_135], %545 {strides = array<i32>} : memref<8x32xf32, #tpu.memory_space<vmem>>, vector<8x32xf32>,
    %c0_136 = arith.constant 0 : index
    %c0_137 = arith.constant 0 : index
    %551 = vector.load %arg7[%c0_136, %c0_137] : memref<8x32xf32, #tpu.memory_space<vmem>>, vector<8x32xf32>
    tpu.vector_store %arg7[%c0_136, %c0_137], %543 {strides = array<i32>} : memref<8x32xf32, #tpu.memory_space<vmem>>, vector<8x32xf32>,
    return
  }
  func.func @transform_0(%arg0: i32) -> (i32, i32, i32) {
    %c0_i32 = arith.constant 0 : i32
    %c0_i32_0 = arith.constant 0 : i32
    %c0_i32_1 = arith.constant 0 : i32
    return %arg0, %c0_i32, %c0_i32_0 : i32, i32, i32
  }
  func.func @transform_1(%arg0: i32) -> (i32, i32) {
    %c0_i32 = arith.constant 0 : i32
    %c0_i32_0 = arith.constant 0 : i32
    %c0_i32_1 = arith.constant 0 : i32
    return %c0_i32, %c0_i32_0 : i32, i32
  }
  func.func @transform_2(%arg0: i32) -> (i32, i32) {
    %c0_i32 = arith.constant 0 : i32
    %c0_i32_0 = arith.constant 0 : i32
    %c0_i32_1 = arith.constant 0 : i32
    return %c0_i32, %c0_i32_0 : i32, i32
  }
  func.func @transform_3(%arg0: i32) -> (i32, i32) {
    %c0_i32 = arith.constant 0 : i32
    %c0_i32_0 = arith.constant 0 : i32
    %c0_i32_1 = arith.constant 0 : i32
    return %c0_i32, %c0_i32_0 : i32, i32
  }
  func.func @transform_4(%arg0: i32) -> (i32, i32, i32) {
    %c0_i32 = arith.constant 0 : i32
    %c0_i32_0 = arith.constant 0 : i32
    %c0_i32_1 = arith.constant 0 : i32
    return %arg0, %c0_i32, %c0_i32_0 : i32, i32, i32
  }
  func.func @transform_5(%arg0: i32) -> (i32, i32) {
    %c0_i32 = arith.constant 0 : i32
    %c0_i32_0 = arith.constant 0 : i32
    %c0_i32_1 = arith.constant 0 : i32
    return %c0_i32, %c0_i32_0 : i32, i32
  }
  func.func @transform_6(%arg0: i32) -> (i32, i32) {
    %c0_i32 = arith.constant 0 : i32
    %c0_i32_0 = arith.constant 0 : i32
    %c0_i32_1 = arith.constant 0 : i32
    return %c0_i32, %c0_i32_0 : i32, i32
  }
}

</mosaic_0001>

<bundles_post_ra>
// kernel: encoder_forward.1
= control target key start
LH: loop header
LB: loop body
LE: loop exit
PB: predicated region body
PF: predicated region fallthrough
CT: control target
= control target key end

     0   :  { %12 = vsyncpa [#allocation3], 0  ;;  %vm27_vm0 = vcmask 261120   ;;  %v2258_v1 = vmov 0.0   ;;  %vm2259_vm1 = vmmov 0   ;;  %s2693_s0 = inlined_call_operand.vmem [shape: f32[16,8,128], index: 0, kind: input, shape index: {}]   ;;  %s2694_s1 = inlined_call_operand.vmem [shape: f32[32,128], index: 1, kind: input, shape index: {}]   ;;  %s2695_s2 = inlined_call_operand.vmem [shape: f32[8,32], index: 2, kind: input, shape index: {}, may-alias: {2,3}]   ;;  %s2696_s3 = inlined_call_operand.vmem [shape: f32[8,32], index: 3, kind: input, shape index: {}, may-alias: {2,3}]   ;;  %s2697_s4 = inlined_call_operand.vmem [shape: f32[16,8,32], index: 4, kind: output, shape index: {0}]   ;;  %s2698_s5 = inlined_call_operand.hbm [shape: f32[8,32], index: 5, kind: output, shape index: {1}]   ;;  %s2699_s6 = inlined_call_operand.hbm [shape: f32[8,32], index: 6, kind: output, shape index: {2}]  }
   0x1   :  { %v2303_v0 = vld [vmem:[%s2694_s1 + $0x18] sm:$0xff]  ;;  %1901 = vmatprep.subr.mxu0 %v2258_v1  ;;  %v2309_v2 = vld [vmem:[%s2694_s1 + $0x10] sm:$0xff]  ;;  %1909 = vmatprep.mubr.msk.f32.mxu0 %vm2259_vm1, %v2258_v1  ;;  %v26_v3 = vld [vmem:[%s2695_s2] sm:$0xff] }
   0x2   :  { %1902 = vmatpush3.msra.mxu0 %v2303_v0  ;;  %28 = vst.msk [vmem:[#allocation2] sm:$0xff] %vm27_vm0, %v26_v3  ;;  %1912 = vmatprep.subr.mxu1 %v2258_v1 }
   0x3   :  { %13 = vsyncpa [#allocation5], 0  ;;  %1903 = vmatprep.subr.mxu0 %v2258_v1  ;;  %v2323_v4 = vld [vmem:[%s2694_s1 + $0x8] sm:$0xff]  ;;  %1913 = vmatpush3.msra.mxu1 %v2303_v0  ;;  %v2332_v5 = vld [vmem:[%s2694_s1] sm:$0xff]  ;;  %s2260_s10 = smov 64   ;;  %s2261_s11 = smov 32  }
   0x4   :  { %1904 = vmatpush3.msra.mxu0 %v2309_v2  ;;  %1914 = vmatprep.subr.mxu1 %v2258_v1  ;;  %v29_v7 = vld [vmem:[%s2696_s3] sm:$0xff]  ;;  %v1761_v28 = vld [vmem:[%s2693_s0 + $0x8] sm:$0xff]  ;;  %v1765_v46 = vld [vmem:[%s2693_s0 + $0x10] sm:$0xff]  ;;  %s2263_s26 = smov [#allocation4]  }
   0x5   :  { %1905 = vmatprep.subr.mxu0 %v2258_v1  ;;  %1915 = vmatpush3.msra.mxu1 %v2309_v2  ;;  %30 = vst.msk [vmem:[#allocation4] sm:$0xff] %vm27_vm0, %v29_v7  ;;  %v37_v8 = vld [vmem:[%s2693_s0] sm:$0xff]  ;;  %v1769_v3 = vld [vmem:[%s2693_s0 + $0x18] sm:$0xff]  ;;  %s1745_s27 = sshll.u32 %s2263_s26, 4  ;;  %s1746_s27 = int_to_ptr.vmem [resolvable:$true] %s1745_s27 }
   0x6   :  { %1906 = vmatpush3.msra.mxu0 %v2323_v4  ;;  %1916 = vmatprep.subr.mxu1 %v2258_v1  ;;  %s2214_s28 = scalar_lea.vmem %s1746_s27, 128  ;;  %p2219_p1 = scmp.lt.s32.totalorder %s1746_s27, %s1746_s27 }
   0x7   :  { %1907 = vmatprep.subr.mxu0 %v2258_v1  ;;  %1917 = vmatpush3.msra.mxu1 %v2323_v4  ;;  %p2215_p0 = scmp.ne.s32.totalorder %s1746_s27, %s2214_s28  ;;  %p2220_p2 = scmp.lt.s32.totalorder %s2214_s28, %s2214_s28 }
   0x8   :  { %1908 = vmatpush3.msra.mxu0 %v2332_v5  ;;  %1918 = vmatprep.subr.mxu1 %v2258_v1 }
   0x9   :  { %v35_v6 = vld [vmem:[#allocation2] sm:$0xff]  ;;  %1919 = vmatpush3.msra.mxu1 %v2332_v5  ;;  %1920 = vmatprep.mubr.msk.f32.mxu1 %vm2259_vm1, %v2258_v1  ;;  %p2221_p3 = por %p2220_p2, %p2219_p1 }
   0xa   :  { %1910 = vmatmul.mubr.msk.f32.vlgmr.msra.gmra.mxu0 %vm27_vm0, %v35_v6  ;;  %1923 = vmatprep.subr.mxu0 %v2258_v1 }
   0xb   :  { %1924 = vmatpush3.msra.mxu0 %v2303_v0  ;;  %1931 = vmatprep.mubr.msk.f32.mxu0 %vm2259_vm1, %v2258_v1  ;;  %p2222_p4 = pnand %p2221_p3, %p2215_p0 }
   0xc   :  { %1925 = vmatprep.subr.mxu0 %v2258_v1  ;;  %1934 = vmatprep.subr.mxu1 %v2258_v1  ;;  %v36_v13 = vld [vmem:[#allocation4] sm:$0xff] }
   0xd   :  { %1926 = vmatpush3.msra.mxu0 %v2309_v2 }
   0xe   :  { %1927 = vmatprep.subr.mxu0 %v2258_v1 }
   0xf   :  { %1928 = vmatpush3.msra.mxu0 %v2323_v4 }
  0x10   :  { %1929 = vmatprep.subr.mxu0 %v2258_v1 }
  0x11   :  { %1930 = vmatpush3.msra.mxu0 %v2332_v5 }
  0x12   :  { %1945 = vmatprep.subr.mxu0 %v2258_v1 }
  0xca   :  { %v108_v9 = vpop.f32.mrf.mxu0 }
  0xcb   :  { %v112_v10 = vadd.f32 %v108_v9, %v37_v8 }
  0xcc   :  { %v1911_v11 = vpop.f32.mrf.mxu0 }
  0xcd   :  { %2084 = vtanh.f32 %v112_v10  ;;  %v1760_v14 = vmul.f32 -1.442695, %v112_v10 }
  0xcf   :  { %2086 = vpow2.f32 %v1760_v14 }
  0xda   :  { %v2085_v12 = vpop.eup %2084 }
  0xdb   :  { %126 = vrot.lane.b32.xlu0 %v2085_v12, %s2260_s10 }
  0xdc   :  { %v2087_v15 = vpop.eup %2086 }
  0xdd   :  { %v116_v16 = vadd.f32 1.0, %v2087_v15 }
  0xdf   :  { %121 = vrot.lane.b32.xlu0 %v36_v13, %s2261_s11  ;;  %2088 = vrcp.f32 %v116_v16 }
  0xec   :  { %v2089_v17 = vpop.eup %2088 }
 0x14d   :  { %v127_v18 = vpop.permute.xlu0 %126 }
 0x14e   :  { %v129_v19 = vmul.f32 %v2089_v17, %v127_v18 }
 0x150   :  { %131 = vrot.lane.b32.xlu1 %v129_v19, %s2261_s11 }
 0x151   :  { %v122_v20 = vpop.permute.xlu0 %121 }
 0x152   :  { %v124_v21 = vmul.f32 %v2089_v17, %v122_v20 }
 0x1c2   :  { %v132_v22 = vpop.permute.xlu1 %131 }
 0x1c3   :  { %v134_v23 = vadd.f32 %v132_v22, %v124_v21 }
 0x1c5   :  { %2090 = vtanh.f32 %v134_v23 }
 0x1d2   :  { %v2091_v24 = vpop.eup %2090 }
 0x1d3   :  { %137 = vrot.lane.b32.xlu1 %v2091_v24, %s2260_s10 }
 0x245   :  { %v138_v25 = vpop.permute.xlu1 %137 }
 0x246   :  { %v140_v26 = vmul.f32 %v2089_v17, %v138_v25 }
 0x248   :  { %142 = vrot.lane.b32.xlu0 %v140_v26, %s2261_s11 }
 0x2ba   :  { %v143_v27 = vpop.permute.xlu0 %142 }
 0x2bb   :  { %145 = vst.msk [vmem:[%s2697_s4] sm:$0xff] %vm27_vm0, %v143_v27  ;;  %1921 = vmatmul.mubr.msk.f32.vlgmr.msra.gmra.mxu1 %vm27_vm0, %v143_v27 }
 0x2bc   :  { %1935 = vmatpush3.msra.mxu1 %v2303_v0  ;;  %1942 = vmatprep.mubr.msk.f32.mxu1 %vm2259_vm1, %v2258_v1 }
 0x2bd   :  { %1936 = vmatprep.subr.mxu1 %v2258_v1 }
 0x2be   :  { %1937 = vmatpush3.msra.mxu1 %v2309_v2 }
 0x2bf   :  { %1938 = vmatprep.subr.mxu1 %v2258_v1 }
 0x2c0   :  { %1939 = vmatpush3.msra.mxu1 %v2323_v4 }
 0x2c1   :  { %1940 = vmatprep.subr.mxu1 %v2258_v1 }
 0x2c2   :  { %1941 = vmatpush3.msra.mxu1 %v2332_v5 }
 0x2c3   :  { %1956 = vmatprep.subr.mxu1 %v2258_v1 }
 0x37b   :  { %v216_v29 = vpop.f32.mrf.mxu1 }
 0x37c   :  { %v220_v30 = vadd.f32 %v1761_v28, %v216_v29 }
 0x37d   :  { %v1922_v31 = vpop.f32.mrf.mxu1 }
 0x37e   :  { %2092 = vtanh.f32 %v220_v30  ;;  %v1763_v33 = vmul.f32 -1.442695, %v220_v30 }
 0x380   :  { %2094 = vpow2.f32 %v1763_v33 }
 0x38b   :  { %v2093_v32 = vpop.eup %2092 }
 0x38c   :  { %230 = vrot.lane.b32.xlu1 %v2093_v32, %s2260_s10 }
 0x38d   :  { %v2095_v34 = vpop.eup %2094 }
 0x38e   :  { %v224_v35 = vadd.f32 1.0, %v2095_v34 }
 0x390   :  { %2096 = vrcp.f32 %v224_v35 }
 0x39d   :  { %v2097_v36 = vpop.eup %2096 }
 0x39e   :  { %v228_v39 = vmul.f32 %v2097_v36, %v134_v23  ;;  %v1773_v23 = vld [vmem:[%s2693_s0 + $0x20] sm:$0xff] }
 0x3fe   :  { %v231_v37 = vpop.permute.xlu1 %230 }
 0x3ff   :  { %v233_v38 = vmul.f32 %v2097_v36, %v231_v37 }
 0x401   :  { %235 = vrot.lane.b32.xlu0 %v233_v38, %s2261_s11 }
 0x473   :  { %v236_v40 = vpop.permute.xlu0 %235 }
 0x474   :  { %v238_v41 = vadd.f32 %v236_v40, %v228_v39 }
 0x476   :  { %2098 = vtanh.f32 %v238_v41 }
 0x483   :  { %v2099_v42 = vpop.eup %2098 }
 0x484   :  { %241 = vrot.lane.b32.xlu1 %v2099_v42, %s2260_s10 }
 0x4f6   :  { %v242_v43 = vpop.permute.xlu1 %241 }
 0x4f7   :  { %v244_v44 = vmul.f32 %v2097_v36, %v242_v43 }
 0x4f9   :  { %246 = vrot.lane.b32.xlu0 %v244_v44, %s2261_s11 }
 0x56b   :  { %v247_v45 = vpop.permute.xlu0 %246 }
 0x56c   :  { %1764 = vst.msk [vmem:[%s2697_s4 + $0x8] sm:$0xff] %vm27_vm0, %v247_v45  ;;  %1932 = vmatmul.mubr.msk.f32.vlgmr.msra.gmra.mxu0 %vm27_vm0, %v247_v45 }
 0x56d   :  { %1946 = vmatpush3.msra.mxu0 %v2303_v0  ;;  %1953 = vmatprep.mubr.msk.f32.mxu0 %vm2259_vm1, %v2258_v1 }
 0x56e   :  { %1947 = vmatprep.subr.mxu0 %v2258_v1 }
 0x56f   :  { %1948 = vmatpush3.msra.mxu0 %v2309_v2 }
 0x570   :  { %1949 = vmatprep.subr.mxu0 %v2258_v1 }
 0x571   :  { %1950 = vmatpush3.msra.mxu0 %v2323_v4 }
 0x572   :  { %1951 = vmatprep.subr.mxu0 %v2258_v1 }
 0x573   :  { %1952 = vmatpush3.msra.mxu0 %v2332_v5 }
 0x574   :  { %1967 = vmatprep.subr.mxu0 %v2258_v1 }
 0x62c   :  { %v321_v47 = vpop.f32.mrf.mxu0 }
 0x62d   :  { %v325_v48 = vadd.f32 %v1765_v46, %v321_v47 }
 0x62e   :  { %v1933_v49 = vpop.f32.mrf.mxu0 }
 0x62f   :  { %2100 = vtanh.f32 %v325_v48  ;;  %v1767_v51 = vmul.f32 -1.442695, %v325_v48 }
 0x631   :  { %2102 = vpow2.f32 %v1767_v51 }
 0x63c   :  { %v2101_v50 = vpop.eup %2100 }
 0x63d   :  { %335 = vrot.lane.b32.xlu1 %v2101_v50, %s2260_s10 }
 0x63e   :  { %v2103_v52 = vpop.eup %2102 }
 0x63f   :  { %v329_v53 = vadd.f32 1.0, %v2103_v52 }
 0x641   :  { %2104 = vrcp.f32 %v329_v53 }
 0x64e   :  { %v2105_v54 = vpop.eup %2104 }
 0x64f   :  { %v333_v57 = vmul.f32 %v2105_v54, %v238_v41  ;;  %v1777_v41 = vld [vmem:[%s2693_s0 + $0x28] sm:$0xff] }
 0x6af   :  { %v336_v55 = vpop.permute.xlu1 %335 }
 0x6b0   :  { %v338_v56 = vmul.f32 %v2105_v54, %v336_v55 }
 0x6b2   :  { %340 = vrot.lane.b32.xlu0 %v338_v56, %s2261_s11 }
 0x724   :  { %v341_v58 = vpop.permute.xlu0 %340 }
 0x725   :  { %v343_v59 = vadd.f32 %v341_v58, %v333_v57 }
 0x727   :  { %2106 = vtanh.f32 %v343_v59 }
 0x734   :  { %v2107_v60 = vpop.eup %2106 }
 0x735   :  { %346 = vrot.lane.b32.xlu1 %v2107_v60, %s2260_s10 }
 0x7a7   :  { %v347_v61 = vpop.permute.xlu1 %346 }
 0x7a8   :  { %v349_v62 = vmul.f32 %v2105_v54, %v347_v61 }
 0x7aa   :  { %351 = vrot.lane.b32.xlu0 %v349_v62, %s2261_s11 }
 0x81c   :  { %v352_v63 = vpop.permute.xlu0 %351 }
 0x81d   :  { %1768 = vst.msk [vmem:[%s2697_s4 + $0x10] sm:$0xff] %vm27_vm0, %v352_v63  ;;  %1943 = vmatmul.mubr.msk.f32.vlgmr.msra.gmra.mxu1 %vm27_vm0, %v352_v63 }
 0x81e   :  { %1957 = vmatpush3.msra.mxu1 %v2303_v0  ;;  %1964 = vmatprep.mubr.msk.f32.mxu1 %vm2259_vm1, %v2258_v1 }
 0x81f   :  { %1958 = vmatprep.subr.mxu1 %v2258_v1 }
 0x820   :  { %1959 = vmatpush3.msra.mxu1 %v2309_v2 }
 0x821   :  { %1960 = vmatprep.subr.mxu1 %v2258_v1 }
 0x822   :  { %1961 = vmatpush3.msra.mxu1 %v2323_v4 }
 0x823   :  { %1962 = vmatprep.subr.mxu1 %v2258_v1 }
 0x824   :  { %1963 = vmatpush3.msra.mxu1 %v2332_v5 }
 0x825   :  { %1978 = vmatprep.subr.mxu1 %v2258_v1 }
 0x8dd   :  { %v426_v6 = vpop.f32.mrf.mxu1 }
 0x8de   :  { %v430_v7 = vadd.f32 %v1769_v3, %v426_v6 }
 0x8df   :  { %v1944_v8 = vpop.f32.mrf.mxu1 }
 0x8e0   :  { %2108 = vtanh.f32 %v430_v7  ;;  %v1771_v10 = vmul.f32 -1.442695, %v430_v7 }
 0x8e2   :  { %2110 = vpow2.f32 %v1771_v10 }
 0x8ed   :  { %v2109_v9 = vpop.eup %2108 }
 0x8ee   :  { %440 = vrot.lane.b32.xlu1 %v2109_v9, %s2260_s10 }
 0x8ef   :  { %v2111_v11 = vpop.eup %2110 }
 0x8f0   :  { %v434_v12 = vadd.f32 1.0, %v2111_v11 }
 0x8f2   :  { %2112 = vrcp.f32 %v434_v12 }
 0x8ff   :  { %v2113_v13 = vpop.eup %2112 }
 0x900   :  { %v438_v16 = vmul.f32 %v2113_v13, %v343_v59  ;;  %v1781_v59 = vld [vmem:[%s2693_s0 + $0x30] sm:$0xff] }
 0x960   :  { %v441_v14 = vpop.permute.xlu1 %440 }
 0x961   :  { %v443_v15 = vmul.f32 %v2113_v13, %v441_v14 }
 0x963   :  { %445 = vrot.lane.b32.xlu0 %v443_v15, %s2261_s11 }
 0x9d5   :  { %v446_v17 = vpop.permute.xlu0 %445 }
 0x9d6   :  { %v448_v18 = vadd.f32 %v446_v17, %v438_v16 }
 0x9d8   :  { %2114 = vtanh.f32 %v448_v18 }
 0x9e5   :  { %v2115_v19 = vpop.eup %2114 }
 0x9e6   :  { %451 = vrot.lane.b32.xlu1 %v2115_v19, %s2260_s10 }
 0xa58   :  { %v452_v20 = vpop.permute.xlu1 %451 }
 0xa59   :  { %v454_v21 = vmul.f32 %v2113_v13, %v452_v20 }
 0xa5b   :  { %456 = vrot.lane.b32.xlu0 %v454_v21, %s2261_s11 }
 0xacd   :  { %v457_v22 = vpop.permute.xlu0 %456 }
 0xace   :  { %1772 = vst.msk [vmem:[%s2697_s4 + $0x18] sm:$0xff] %vm27_vm0, %v457_v22  ;;  %1954 = vmatmul.mubr.msk.f32.vlgmr.msra.gmra.mxu0 %vm27_vm0, %v457_v22 }
 0xacf   :  { %1968 = vmatpush3.msra.mxu0 %v2303_v0  ;;  %1975 = vmatprep.mubr.msk.f32.mxu0 %vm2259_vm1, %v2258_v1 }
 0xad0   :  { %1969 = vmatprep.subr.mxu0 %v2258_v1 }
 0xad1   :  { %1970 = vmatpush3.msra.mxu0 %v2309_v2 }
 0xad2   :  { %1971 = vmatprep.subr.mxu0 %v2258_v1 }
 0xad3   :  { %1972 = vmatpush3.msra.mxu0 %v2323_v4 }
 0xad4   :  { %1973 = vmatprep.subr.mxu0 %v2258_v1 }
 0xad5   :  { %1974 = vmatpush3.msra.mxu0 %v2332_v5 }
 0xad6   :  { %1989 = vmatprep.subr.mxu0 %v2258_v1 }
 0xb8e   :  { %v531_v24 = vpop.f32.mrf.mxu0 }
 0xb8f   :  { %v535_v25 = vadd.f32 %v1773_v23, %v531_v24 }
 0xb90   :  { %v1955_v26 = vpop.f32.mrf.mxu0 }
 0xb91   :  { %2116 = vtanh.f32 %v535_v25  ;;  %v1775_v28 = vmul.f32 -1.442695, %v535_v25 }
 0xb93   :  { %2118 = vpow2.f32 %v1775_v28 }
 0xb9e   :  { %v2117_v27 = vpop.eup %2116 }
 0xb9f   :  { %545 = vrot.lane.b32.xlu1 %v2117_v27, %s2260_s10 }
 0xba0   :  { %v2119_v29 = vpop.eup %2118 }
 0xba1   :  { %v539_v30 = vadd.f32 1.0, %v2119_v29 }
 0xba3   :  { %2120 = vrcp.f32 %v539_v30 }
 0xbb0   :  { %v2121_v31 = vpop.eup %2120 }
 0xbb1   :  { %v543_v34 = vmul.f32 %v2121_v31, %v448_v18  ;;  %v1785_v18 = vld [vmem:[%s2693_s0 + $0x38] sm:$0xff] }
 0xc11   :  { %v546_v32 = vpop.permute.xlu1 %545 }
 0xc12   :  { %v548_v33 = vmul.f32 %v2121_v31, %v546_v32 }
 0xc14   :  { %550 = vrot.lane.b32.xlu0 %v548_v33, %s2261_s11 }
 0xc86   :  { %v551_v35 = vpop.permute.xlu0 %550 }
 0xc87   :  { %v553_v36 = vadd.f32 %v551_v35, %v543_v34 }
 0xc89   :  { %2122 = vtanh.f32 %v553_v36 }
 0xc96   :  { %v2123_v37 = vpop.eup %2122 }
 0xc97   :  { %556 = vrot.lane.b32.xlu1 %v2123_v37, %s2260_s10 }
 0xd09   :  { %v557_v38 = vpop.permute.xlu1 %556 }
 0xd0a   :  { %v559_v39 = vmul.f32 %v2121_v31, %v557_v38 }
 0xd0c   :  { %561 = vrot.lane.b32.xlu0 %v559_v39, %s2261_s11 }
 0xd7e   :  { %v562_v40 = vpop.permute.xlu0 %561 }
 0xd7f   :  { %1776 = vst.msk [vmem:[%s2697_s4 + $0x20] sm:$0xff] %vm27_vm0, %v562_v40  ;;  %1965 = vmatmul.mubr.msk.f32.vlgmr.msra.gmra.mxu1 %vm27_vm0, %v562_v40 }
 0xd80   :  { %1979 = vmatpush3.msra.mxu1 %v2303_v0  ;;  %1986 = vmatprep.mubr.msk.f32.mxu1 %vm2259_vm1, %v2258_v1 }
 0xd81   :  { %1980 = vmatprep.subr.mxu1 %v2258_v1 }
 0xd82   :  { %1981 = vmatpush3.msra.mxu1 %v2309_v2 }
 0xd83   :  { %1982 = vmatprep.subr.mxu1 %v2258_v1 }
 0xd84   :  { %1983 = vmatpush3.msra.mxu1 %v2323_v4 }
 0xd85   :  { %1984 = vmatprep.subr.mxu1 %v2258_v1 }
 0xd86   :  { %1985 = vmatpush3.msra.mxu1 %v2332_v5 }
 0xd87   :  { %2000 = vmatprep.subr.mxu1 %v2258_v1 }
 0xe3f   :  { %v636_v42 = vpop.f32.mrf.mxu1 }
 0xe40   :  { %v640_v43 = vadd.f32 %v1777_v41, %v636_v42 }
 0xe41   :  { %v1966_v44 = vpop.f32.mrf.mxu1 }
 0xe42   :  { %2124 = vtanh.f32 %v640_v43  ;;  %v1779_v46 = vmul.f32 -1.442695, %v640_v43 }
 0xe44   :  { %2126 = vpow2.f32 %v1779_v46 }
 0xe4f   :  { %v2125_v45 = vpop.eup %2124 }
 0xe50   :  { %650 = vrot.lane.b32.xlu1 %v2125_v45, %s2260_s10 }
 0xe51   :  { %v2127_v47 = vpop.eup %2126 }
 0xe52   :  { %v644_v48 = vadd.f32 1.0, %v2127_v47 }
 0xe54   :  { %2128 = vrcp.f32 %v644_v48 }
 0xe61   :  { %v2129_v49 = vpop.eup %2128 }
 0xe62   :  { %v648_v52 = vmul.f32 %v2129_v49, %v553_v36  ;;  %v1789_v36 = vld [vmem:[%s2693_s0 + $0x40] sm:$0xff] }
 0xec2   :  { %v651_v50 = vpop.permute.xlu1 %650 }
 0xec3   :  { %v653_v51 = vmul.f32 %v2129_v49, %v651_v50 }
 0xec5   :  { %655 = vrot.lane.b32.xlu0 %v653_v51, %s2261_s11 }
 0xf37   :  { %v656_v53 = vpop.permute.xlu0 %655 }
 0xf38   :  { %v658_v54 = vadd.f32 %v656_v53, %v648_v52 }
 0xf3a   :  { %2130 = vtanh.f32 %v658_v54 }
 0xf47   :  { %v2131_v55 = vpop.eup %2130 }
 0xf48   :  { %661 = vrot.lane.b32.xlu1 %v2131_v55, %s2260_s10 }
 0xfba   :  { %v662_v56 = vpop.permute.xlu1 %661 }
 0xfbb   :  { %v664_v57 = vmul.f32 %v2129_v49, %v662_v56 }
 0xfbd   :  { %666 = vrot.lane.b32.xlu0 %v664_v57, %s2261_s11 }
0x102f   :  { %v667_v58 = vpop.permute.xlu0 %666 }
0x1030   :  { %1780 = vst.msk [vmem:[%s2697_s4 + $0x28] sm:$0xff] %vm27_vm0, %v667_v58  ;;  %1976 = vmatmul.mubr.msk.f32.vlgmr.msra.gmra.mxu0 %vm27_vm0, %v667_v58 }
0x1031   :  { %1990 = vmatpush3.msra.mxu0 %v2303_v0  ;;  %1997 = vmatprep.mubr.msk.f32.mxu0 %vm2259_vm1, %v2258_v1 }
0x1032   :  { %1991 = vmatprep.subr.mxu0 %v2258_v1 }
0x1033   :  { %1992 = vmatpush3.msra.mxu0 %v2309_v2 }
0x1034   :  { %1993 = vmatprep.subr.mxu0 %v2258_v1 }
0x1035   :  { %1994 = vmatpush3.msra.mxu0 %v2323_v4 }
0x1036   :  { %1995 = vmatprep.subr.mxu0 %v2258_v1 }
0x1037   :  { %1996 = vmatpush3.msra.mxu0 %v2332_v5 }
0x1038   :  { %2011 = vmatprep.subr.mxu0 %v2258_v1 }
0x10f0   :  { %v741_v60 = vpop.f32.mrf.mxu0 }
0x10f1   :  { %v745_v61 = vadd.f32 %v1781_v59, %v741_v60 }
0x10f2   :  { %v1977_v62 = vpop.f32.mrf.mxu0 }
0x10f3   :  { %2132 = vtanh.f32 %v745_v61  ;;  %v1783_v3 = vmul.f32 -1.442695, %v745_v61 }
0x10f5   :  { %2134 = vpow2.f32 %v1783_v3 }
0x1100   :  { %v2133_v63 = vpop.eup %2132 }
0x1101   :  { %755 = vrot.lane.b32.xlu1 %v2133_v63, %s2260_s10 }
0x1102   :  { %v2135_v6 = vpop.eup %2134 }
0x1103   :  { %v749_v7 = vadd.f32 1.0, %v2135_v6 }
0x1105   :  { %2136 = vrcp.f32 %v749_v7 }
0x1112   :  { %v2137_v8 = vpop.eup %2136 }
0x1113   :  { %v753_v11 = vmul.f32 %v2137_v8, %v658_v54  ;;  %v1793_v54 = vld [vmem:[%s2693_s0 + $0x48] sm:$0xff] }
0x1173   :  { %v756_v9 = vpop.permute.xlu1 %755 }
0x1174   :  { %v758_v10 = vmul.f32 %v2137_v8, %v756_v9 }
0x1176   :  { %760 = vrot.lane.b32.xlu0 %v758_v10, %s2261_s11 }
0x11e8   :  { %v761_v12 = vpop.permute.xlu0 %760 }
0x11e9   :  { %v763_v13 = vadd.f32 %v761_v12, %v753_v11 }
0x11eb   :  { %2138 = vtanh.f32 %v763_v13 }
0x11f8   :  { %v2139_v14 = vpop.eup %2138 }
0x11f9   :  { %766 = vrot.lane.b32.xlu1 %v2139_v14, %s2260_s10 }
0x126b   :  { %v767_v15 = vpop.permute.xlu1 %766 }
0x126c   :  { %v769_v16 = vmul.f32 %v2137_v8, %v767_v15 }
0x126e   :  { %771 = vrot.lane.b32.xlu0 %v769_v16, %s2261_s11 }
0x12e0   :  { %v772_v17 = vpop.permute.xlu0 %771 }
0x12e1   :  { %1784 = vst.msk [vmem:[%s2697_s4 + $0x30] sm:$0xff] %vm27_vm0, %v772_v17  ;;  %1987 = vmatmul.mubr.msk.f32.vlgmr.msra.gmra.mxu1 %vm27_vm0, %v772_v17 }
0x12e2   :  { %2001 = vmatpush3.msra.mxu1 %v2303_v0  ;;  %2008 = vmatprep.mubr.msk.f32.mxu1 %vm2259_vm1, %v2258_v1 }
0x12e3   :  { %2002 = vmatprep.subr.mxu1 %v2258_v1 }
0x12e4   :  { %2003 = vmatpush3.msra.mxu1 %v2309_v2 }
0x12e5   :  { %2004 = vmatprep.subr.mxu1 %v2258_v1 }
0x12e6   :  { %2005 = vmatpush3.msra.mxu1 %v2323_v4 }
0x12e7   :  { %2006 = vmatprep.subr.mxu1 %v2258_v1 }
0x12e8   :  { %2007 = vmatpush3.msra.mxu1 %v2332_v5 }
0x12e9   :  { %2022 = vmatprep.subr.mxu1 %v2258_v1 }
0x13a1   :  { %v846_v19 = vpop.f32.mrf.mxu1 }
0x13a2   :  { %v850_v20 = vadd.f32 %v1785_v18, %v846_v19 }
0x13a3   :  { %v1988_v21 = vpop.f32.mrf.mxu1 }
0x13a4   :  { %2140 = vtanh.f32 %v850_v20  ;;  %v1787_v23 = vmul.f32 -1.442695, %v850_v20 }
0x13a6   :  { %2142 = vpow2.f32 %v1787_v23 }
0x13b1   :  { %v2141_v22 = vpop.eup %2140 }
0x13b2   :  { %860 = vrot.lane.b32.xlu1 %v2141_v22, %s2260_s10 }
0x13b3   :  { %v2143_v24 = vpop.eup %2142 }
0x13b4   :  { %v854_v25 = vadd.f32 1.0, %v2143_v24 }
0x13b6   :  { %2144 = vrcp.f32 %v854_v25 }
0x13c3   :  { %v2145_v26 = vpop.eup %2144 }
0x13c4   :  { %v858_v29 = vmul.f32 %v2145_v26, %v763_v13  ;;  %v1797_v13 = vld [vmem:[%s2693_s0 + $0x50] sm:$0xff] }
0x1424   :  { %v861_v27 = vpop.permute.xlu1 %860 }
0x1425   :  { %v863_v28 = vmul.f32 %v2145_v26, %v861_v27 }
0x1427   :  { %865 = vrot.lane.b32.xlu0 %v863_v28, %s2261_s11 }
0x1499   :  { %v866_v30 = vpop.permute.xlu0 %865 }
0x149a   :  { %v868_v31 = vadd.f32 %v866_v30, %v858_v29 }
0x149c   :  { %2146 = vtanh.f32 %v868_v31 }
0x14a9   :  { %v2147_v32 = vpop.eup %2146 }
0x14aa   :  { %871 = vrot.lane.b32.xlu1 %v2147_v32, %s2260_s10 }
0x151c   :  { %v872_v33 = vpop.permute.xlu1 %871 }
0x151d   :  { %v874_v34 = vmul.f32 %v2145_v26, %v872_v33 }
0x151f   :  { %876 = vrot.lane.b32.xlu0 %v874_v34, %s2261_s11 }
0x1591   :  { %v877_v35 = vpop.permute.xlu0 %876 }
0x1592   :  { %1788 = vst.msk [vmem:[%s2697_s4 + $0x38] sm:$0xff] %vm27_vm0, %v877_v35  ;;  %1998 = vmatmul.mubr.msk.f32.vlgmr.msra.gmra.mxu0 %vm27_vm0, %v877_v35 }
0x1593   :  { %2012 = vmatpush3.msra.mxu0 %v2303_v0  ;;  %2019 = vmatprep.mubr.msk.f32.mxu0 %vm2259_vm1, %v2258_v1 }
0x1594   :  { %2013 = vmatprep.subr.mxu0 %v2258_v1 }
0x1595   :  { %2014 = vmatpush3.msra.mxu0 %v2309_v2 }
0x1596   :  { %2015 = vmatprep.subr.mxu0 %v2258_v1 }
0x1597   :  { %2016 = vmatpush3.msra.mxu0 %v2323_v4 }
0x1598   :  { %2017 = vmatprep.subr.mxu0 %v2258_v1 }
0x1599   :  { %2018 = vmatpush3.msra.mxu0 %v2332_v5 }
0x159a   :  { %2033 = vmatprep.subr.mxu0 %v2258_v1 }
0x1652   :  { %v951_v37 = vpop.f32.mrf.mxu0 }
0x1653   :  { %v955_v38 = vadd.f32 %v1789_v36, %v951_v37 }
0x1654   :  { %v1999_v39 = vpop.f32.mrf.mxu0 }
0x1655   :  { %2148 = vtanh.f32 %v955_v38  ;;  %v1791_v41 = vmul.f32 -1.442695, %v955_v38 }
0x1657   :  { %2150 = vpow2.f32 %v1791_v41 }
0x1662   :  { %v2149_v40 = vpop.eup %2148 }
0x1663   :  { %965 = vrot.lane.b32.xlu1 %v2149_v40, %s2260_s10 }
0x1664   :  { %v2151_v42 = vpop.eup %2150 }
0x1665   :  { %v959_v43 = vadd.f32 1.0, %v2151_v42 }
0x1667   :  { %2152 = vrcp.f32 %v959_v43 }
0x1674   :  { %v2153_v44 = vpop.eup %2152 }
0x1675   :  { %v963_v47 = vmul.f32 %v2153_v44, %v868_v31  ;;  %v1801_v31 = vld [vmem:[%s2693_s0 + $0x58] sm:$0xff] }
0x16d5   :  { %v966_v45 = vpop.permute.xlu1 %965 }
0x16d6   :  { %v968_v46 = vmul.f32 %v2153_v44, %v966_v45 }
0x16d8   :  { %970 = vrot.lane.b32.xlu0 %v968_v46, %s2261_s11 }
0x174a   :  { %v971_v48 = vpop.permute.xlu0 %970 }
0x174b   :  { %v973_v49 = vadd.f32 %v971_v48, %v963_v47 }
0x174d   :  { %2154 = vtanh.f32 %v973_v49 }
0x175a   :  { %v2155_v50 = vpop.eup %2154 }
0x175b   :  { %976 = vrot.lane.b32.xlu1 %v2155_v50, %s2260_s10 }
0x17cd   :  { %v977_v51 = vpop.permute.xlu1 %976 }
0x17ce   :  { %v979_v52 = vmul.f32 %v2153_v44, %v977_v51 }
0x17d0   :  { %981 = vrot.lane.b32.xlu0 %v979_v52, %s2261_s11 }
0x1842   :  { %v982_v53 = vpop.permute.xlu0 %981 }
0x1843   :  { %1792 = vst.msk [vmem:[%s2697_s4 + $0x40] sm:$0xff] %vm27_vm0, %v982_v53  ;;  %2009 = vmatmul.mubr.msk.f32.vlgmr.msra.gmra.mxu1 %vm27_vm0, %v982_v53 }
0x1844   :  { %2023 = vmatpush3.msra.mxu1 %v2303_v0  ;;  %2030 = vmatprep.mubr.msk.f32.mxu1 %vm2259_vm1, %v2258_v1 }
0x1845   :  { %2024 = vmatprep.subr.mxu1 %v2258_v1 }
0x1846   :  { %2025 = vmatpush3.msra.mxu1 %v2309_v2 }
0x1847   :  { %2026 = vmatprep.subr.mxu1 %v2258_v1 }
0x1848   :  { %2027 = vmatpush3.msra.mxu1 %v2323_v4 }
0x1849   :  { %2028 = vmatprep.subr.mxu1 %v2258_v1 }
0x184a   :  { %2029 = vmatpush3.msra.mxu1 %v2332_v5 }
0x184b   :  { %2044 = vmatprep.subr.mxu1 %v2258_v1 }
0x1903   :  { %v1056_v55 = vpop.f32.mrf.mxu1 }
0x1904   :  { %v1060_v56 = vadd.f32 %v1793_v54, %v1056_v55 }
0x1905   :  { %v2010_v57 = vpop.f32.mrf.mxu1 }
0x1906   :  { %2156 = vtanh.f32 %v1060_v56  ;;  %v1795_v59 = vmul.f32 -1.442695, %v1060_v56 }
0x1908   :  { %2158 = vpow2.f32 %v1795_v59 }
0x1913   :  { %v2157_v58 = vpop.eup %2156 }
0x1914   :  { %1070 = vrot.lane.b32.xlu1 %v2157_v58, %s2260_s10 }
0x1915   :  { %v2159_v60 = vpop.eup %2158 }
0x1916   :  { %v1064_v61 = vadd.f32 1.0, %v2159_v60 }
0x1918   :  { %2160 = vrcp.f32 %v1064_v61 }
0x1925   :  { %v2161_v62 = vpop.eup %2160 }
0x1926   :  { %v1068_v6 = vmul.f32 %v2161_v62, %v973_v49  ;;  %v1805_v49 = vld [vmem:[%s2693_s0 + $0x60] sm:$0xff] }
0x1986   :  { %v1071_v63 = vpop.permute.xlu1 %1070 }
0x1987   :  { %v1073_v3 = vmul.f32 %v2161_v62, %v1071_v63 }
0x1989   :  { %1075 = vrot.lane.b32.xlu0 %v1073_v3, %s2261_s11 }
0x19fb   :  { %v1076_v7 = vpop.permute.xlu0 %1075 }
0x19fc   :  { %v1078_v8 = vadd.f32 %v1076_v7, %v1068_v6  ;;  %v2212_v6 = vld [vmem:[%s2694_s1 + $0x18] sm:$0xff]  ;;  %v2213_v7 = vld [vmem:[%s2694_s1 + $0x10] sm:$0xff] }
0x19fe   :  { %2162 = vtanh.f32 %v1078_v8 }
0x1a0b   :  { %v2163_v9 = vpop.eup %2162 }
0x1a0c   :  { %1081 = vrot.lane.b32.xlu1 %v2163_v9, %s2260_s10 }
0x1a7e   :  { %v1082_v10 = vpop.permute.xlu1 %1081 }
0x1a7f   :  { %v1084_v11 = vmul.f32 %v2161_v62, %v1082_v10 }
0x1a81   :  { %1086 = vrot.lane.b32.xlu0 %v1084_v11, %s2261_s11 }
0x1af3   :  { %v1087_v12 = vpop.permute.xlu0 %1086 }
0x1af4   :  { %1796 = vst.msk [vmem:[%s2697_s4 + $0x48] sm:$0xff] %vm27_vm0, %v1087_v12  ;;  %2020 = vmatmul.mubr.msk.f32.vlgmr.msra.gmra.mxu0 %vm27_vm0, %v1087_v12 }
0x1af5   :  { %2034 = vmatpush3.msra.mxu0 %v2303_v0  ;;  %2041 = vmatprep.mubr.msk.f32.mxu0 %vm2259_vm1, %v2258_v1 }
0x1af6   :  { %2035 = vmatprep.subr.mxu0 %v2258_v1 }
0x1af7   :  { %2036 = vmatpush3.msra.mxu0 %v2309_v2 }
0x1af8   :  { %2037 = vmatprep.subr.mxu0 %v2258_v1 }
0x1af9   :  { %2038 = vmatpush3.msra.mxu0 %v2323_v4 }
0x1afa   :  { %2039 = vmatprep.subr.mxu0 %v2258_v1 }
0x1afb   :  { %2040 = vmatpush3.msra.mxu0 %v2332_v5 }
0x1afc   :  { %2055 = vmatprep.subr.mxu0 %v2258_v1 }
0x1bb4   :  { %v1161_v14 = vpop.f32.mrf.mxu0 }
0x1bb5   :  { %v1165_v15 = vadd.f32 %v1797_v13, %v1161_v14 }
0x1bb6   :  { %v2021_v16 = vpop.f32.mrf.mxu0 }
0x1bb7   :  { %2164 = vtanh.f32 %v1165_v15  ;;  %v1799_v18 = vmul.f32 -1.442695, %v1165_v15 }
0x1bb9   :  { %2166 = vpow2.f32 %v1799_v18 }
0x1bc4   :  { %v2165_v17 = vpop.eup %2164 }
0x1bc5   :  { %1175 = vrot.lane.b32.xlu1 %v2165_v17, %s2260_s10 }
0x1bc6   :  { %v2167_v19 = vpop.eup %2166 }
0x1bc7   :  { %v1169_v20 = vadd.f32 1.0, %v2167_v19 }
0x1bc9   :  { %2168 = vrcp.f32 %v1169_v20 }
0x1bd6   :  { %v2169_v21 = vpop.eup %2168 }
0x1bd7   :  { %v1173_v24 = vmul.f32 %v2169_v21, %v1078_v8  ;;  %v1809_v8 = vld [vmem:[%s2693_s0 + $0x68] sm:$0xff] }
0x1c37   :  { %v1176_v22 = vpop.permute.xlu1 %1175 }
0x1c38   :  { %v1178_v23 = vmul.f32 %v2169_v21, %v1176_v22 }
0x1c3a   :  { %1180 = vrot.lane.b32.xlu0 %v1178_v23, %s2261_s11  ;;  %v1813_v23 = vld [vmem:[%s2693_s0 + $0x70] sm:$0xff] }
0x1cac   :  { %v1181_v25 = vpop.permute.xlu0 %1180 }
0x1cad   :  { %v1183_v26 = vadd.f32 %v1181_v25, %v1173_v24 }
0x1caf   :  { %2170 = vtanh.f32 %v1183_v26 }
0x1cbc   :  { %v2171_v27 = vpop.eup %2170 }
0x1cbd   :  { %1186 = vrot.lane.b32.xlu1 %v2171_v27, %s2260_s10 }
0x1d2f   :  { %v1187_v28 = vpop.permute.xlu1 %1186 }
0x1d30   :  { %v1189_v29 = vmul.f32 %v2169_v21, %v1187_v28 }
0x1d32   :  { %1191 = vrot.lane.b32.xlu0 %v1189_v29, %s2261_s11 }
0x1da4   :  { %v1192_v30 = vpop.permute.xlu0 %1191 }
0x1da5   :  { %1800 = vst.msk [vmem:[%s2697_s4 + $0x50] sm:$0xff] %vm27_vm0, %v1192_v30  ;;  %2031 = vmatmul.mubr.msk.f32.vlgmr.msra.gmra.mxu1 %vm27_vm0, %v1192_v30 }
0x1da6   :  { %2045 = vmatpush3.msra.mxu1 %v2303_v0  ;;  %2052 = vmatprep.mubr.msk.f32.mxu1 %vm2259_vm1, %v2258_v1 }
0x1da7   :  { %2046 = vmatprep.subr.mxu1 %v2258_v1 }
0x1da8   :  { %2047 = vmatpush3.msra.mxu1 %v2309_v2 }
0x1da9   :  { %2048 = vmatprep.subr.mxu1 %v2258_v1 }
0x1daa   :  { %2049 = vmatpush3.msra.mxu1 %v2323_v4 }
0x1dab   :  { %2050 = vmatprep.subr.mxu1 %v2258_v1 }
0x1dac   :  { %2051 = vmatpush3.msra.mxu1 %v2332_v5 }
0x1dad   :  { %2066 = vmatprep.subr.mxu1 %v2258_v1 }
0x1e65   :  { %v1266_v32 = vpop.f32.mrf.mxu1 }
0x1e66   :  { %v1270_v33 = vadd.f32 %v1801_v31, %v1266_v32 }
0x1e67   :  { %v2032_v34 = vpop.f32.mrf.mxu1 }
0x1e68   :  { %2172 = vtanh.f32 %v1270_v33  ;;  %v1803_v36 = vmul.f32 -1.442695, %v1270_v33 }
0x1e6a   :  { %2174 = vpow2.f32 %v1803_v36 }
0x1e75   :  { %v2173_v35 = vpop.eup %2172 }
0x1e76   :  { %1280 = vrot.lane.b32.xlu1 %v2173_v35, %s2260_s10 }
0x1e77   :  { %v2175_v37 = vpop.eup %2174 }
0x1e78   :  { %v1274_v38 = vadd.f32 1.0, %v2175_v37 }
0x1e7a   :  { %2176 = vrcp.f32 %v1274_v38 }
0x1e87   :  { %v2177_v39 = vpop.eup %2176 }
0x1e88   :  { %v1278_v42 = vmul.f32 %v2177_v39, %v1183_v26 }
0x1ee8   :  { %v1281_v40 = vpop.permute.xlu1 %1280 }
0x1ee9   :  { %v1283_v41 = vmul.f32 %v2177_v39, %v1281_v40 }
0x1eeb   :  { %1285 = vrot.lane.b32.xlu0 %v1283_v41, %s2261_s11  ;;  %v1817_v41 = vld [vmem:[%s2693_s0 + $0x78] sm:$0xff]  ;;  %s2262_s0 = smov 96  }
0x1f5d   :  { %v1286_v43 = vpop.permute.xlu0 %1285 }
0x1f5e   :  { %v1288_v44 = vadd.f32 %v1286_v43, %v1278_v42 }
0x1f60   :  { %2178 = vtanh.f32 %v1288_v44 }
0x1f6d   :  { %v2179_v45 = vpop.eup %2178 }
0x1f6e   :  { %1291 = vrot.lane.b32.xlu1 %v2179_v45, %s2260_s10 }
0x1fe0   :  { %v1292_v46 = vpop.permute.xlu1 %1291 }
0x1fe1   :  { %v1294_v47 = vmul.f32 %v2177_v39, %v1292_v46 }
0x1fe3   :  { %1296 = vrot.lane.b32.xlu0 %v1294_v47, %s2261_s11 }
0x2055   :  { %v1297_v48 = vpop.permute.xlu0 %1296 }
0x2056   :  { %1804 = vst.msk [vmem:[%s2697_s4 + $0x58] sm:$0xff] %vm27_vm0, %v1297_v48  ;;  %2042 = vmatmul.mubr.msk.f32.vlgmr.msra.gmra.mxu0 %vm27_vm0, %v1297_v48 }
0x2057   :  { %2056 = vmatpush3.msra.mxu0 %v2303_v0  ;;  %2063 = vmatprep.mubr.msk.f32.mxu0 %vm2259_vm1, %v2258_v1 }
0x2058   :  { %2057 = vmatprep.subr.mxu0 %v2258_v1 }
0x2059   :  { %2058 = vmatpush3.msra.mxu0 %v2309_v2 }
0x205a   :  { %2059 = vmatprep.subr.mxu0 %v2258_v1 }
0x205b   :  { %2060 = vmatpush3.msra.mxu0 %v2323_v4 }
0x205c   :  { %2061 = vmatprep.subr.mxu0 %v2258_v1 }
0x205d   :  { %2062 = vmatpush3.msra.mxu0 %v2332_v5 }
0x2116   :  { %v1371_v0 = vpop.f32.mrf.mxu0 }
0x2117   :  { %v1375_v50 = vadd.f32 %v1805_v49, %v1371_v0 }
0x2118   :  { %v2043_v51 = vpop.f32.mrf.mxu0 }
0x2119   :  { %2180 = vtanh.f32 %v1375_v50  ;;  %v1807_v2 = vmul.f32 -1.442695, %v1375_v50 }
0x211b   :  { %2182 = vpow2.f32 %v1807_v2 }
0x2126   :  { %v2181_v52 = vpop.eup %2180 }
0x2127   :  { %1385 = vrot.lane.b32.xlu1 %v2181_v52, %s2260_s10 }
0x2128   :  { %v2183_v53 = vpop.eup %2182 }
0x2129   :  { %v1379_v54 = vadd.f32 1.0, %v2183_v53 }
0x212b   :  { %2184 = vrcp.f32 %v1379_v54 }
0x2138   :  { %v2185_v55 = vpop.eup %2184 }
0x2139   :  { %v1383_v58 = vmul.f32 %v2185_v55, %v1288_v44 }
0x2199   :  { %v1386_v56 = vpop.permute.xlu1 %1385 }
0x219a   :  { %v1388_v57 = vmul.f32 %v2185_v55, %v1386_v56 }
0x219c   :  { %1390 = vrot.lane.b32.xlu0 %v1388_v57, %s2261_s11 }
0x220e   :  { %v1391_v59 = vpop.permute.xlu0 %1390 }
0x220f   :  { %v1393_v60 = vadd.f32 %v1391_v59, %v1383_v58 }
0x2211   :  { %2186 = vtanh.f32 %v1393_v60 }
0x221e   :  { %v2187_v61 = vpop.eup %2186 }
0x221f   :  { %1396 = vrot.lane.b32.xlu1 %v2187_v61, %s2260_s10 }
0x2291   :  { %v1397_v62 = vpop.permute.xlu1 %1396 }
0x2292   :  { %v1399_v63 = vmul.f32 %v2185_v55, %v1397_v62 }
0x2294   :  { %1401 = vrot.lane.b32.xlu0 %v1399_v63, %s2261_s11 }
0x2306   :  { %v1402_v3 = vpop.permute.xlu0 %1401 }
0x2307   :  { %1808 = vst.msk [vmem:[%s2697_s4 + $0x60] sm:$0xff] %vm27_vm0, %v1402_v3  ;;  %2053 = vmatmul.mubr.msk.f32.vlgmr.msra.gmra.mxu1 %vm27_vm0, %v1402_v3 }
0x2308   :  { %2067 = vmatpush3.msra.mxu1 %v2212_v6  ;;  %2074 = vmatprep.mubr.msk.f32.mxu1 %vm2259_vm1, %v2258_v1 }
0x2309   :  { %2068 = vmatprep.subr.mxu1 %v2258_v1 }
0x230a   :  { %2069 = vmatpush3.msra.mxu1 %v2213_v7 }
0x230b   :  { %2070 = vmatprep.subr.mxu1 %v2258_v1 }
0x230c   :  { %2071 = vmatpush3.msra.mxu1 %v2323_v4 }
0x230d   :  { %2072 = vmatprep.subr.mxu1 %v2258_v1 }
0x230e   :  { %2073 = vmatpush3.msra.mxu1 %v2332_v5 }
0x23c7   :  { %v1476_v9 = vpop.f32.mrf.mxu1 }
0x23c8   :  { %v1480_v10 = vadd.f32 %v1809_v8, %v1476_v9 }
0x23c9   :  { %v2054_v11 = vpop.f32.mrf.mxu1 }
0x23ca   :  { %2188 = vtanh.f32 %v1480_v10  ;;  %v1811_v13 = vmul.f32 -1.442695, %v1480_v10 }
0x23cc   :  { %2190 = vpow2.f32 %v1811_v13 }
0x23d7   :  { %v2189_v12 = vpop.eup %2188 }
0x23d8   :  { %1490 = vrot.lane.b32.xlu1 %v2189_v12, %s2260_s10 }
0x23d9   :  { %v2191_v14 = vpop.eup %2190 }
0x23da   :  { %v1484_v15 = vadd.f32 1.0, %v2191_v14 }
0x23dc   :  { %2192 = vrcp.f32 %v1484_v15 }
0x23e9   :  { %v2193_v4 = vpop.eup %2192 }
0x23ea   :  { %v1488_v5 = vmul.f32 %v2193_v4, %v1393_v60 }
0x244a   :  { %v1491_v1 = vpop.permute.xlu1 %1490 }
0x244b   :  { %v1493_v16 = vmul.f32 %v2193_v4, %v1491_v1 }
0x244d   :  { %1495 = vrot.lane.b32.xlu0 %v1493_v16, %s2261_s11 }
0x24bf   :  { %v1496_v17 = vpop.permute.xlu0 %1495 }
0x24c0   :  { %v1498_v18 = vadd.f32 %v1496_v17, %v1488_v5 }
0x24c2   :  { %2194 = vtanh.f32 %v1498_v18 }
0x24cf   :  { %v2195_v19 = vpop.eup %2194 }
0x24d0   :  { %1501 = vrot.lane.b32.xlu1 %v2195_v19, %s2260_s10 }
0x2542   :  { %v1502_v20 = vpop.permute.xlu1 %1501 }
0x2543   :  { %v1504_v21 = vmul.f32 %v2193_v4, %v1502_v20 }
0x2545   :  { %1506 = vrot.lane.b32.xlu0 %v1504_v21, %s2261_s11 }
0x25b7   :  { %v1507_v22 = vpop.permute.xlu0 %1506 }
0x25b8   :  { %1812 = vst.msk [vmem:[%s2697_s4 + $0x68] sm:$0xff] %vm27_vm0, %v1507_v22  ;;  %2064 = vmatmul.mubr.msk.f32.vlgmr.msra.gmra.mxu0 %vm27_vm0, %v1507_v22 }
0x2678   :  { %v1581_v24 = vpop.f32.mrf.mxu0 }
0x2679   :  { %v1585_v25 = vadd.f32 %v1813_v23, %v1581_v24 }
0x267a   :  { %v2065_v26 = vpop.f32.mrf.mxu0 }
0x267b   :  { %2196 = vtanh.f32 %v1585_v25  ;;  %v1815_v28 = vmul.f32 -1.442695, %v1585_v25 }
0x267d   :  { %2198 = vpow2.f32 %v1815_v28 }
0x2688   :  { %v2197_v27 = vpop.eup %2196 }
0x2689   :  { %1595 = vrot.lane.b32.xlu1 %v2197_v27, %s2260_s10 }
0x268a   :  { %v2199_v29 = vpop.eup %2198 }
0x268b   :  { %v1589_v30 = vadd.f32 1.0, %v2199_v29 }
0x268d   :  { %2200 = vrcp.f32 %v1589_v30 }
0x269a   :  { %v2201_v31 = vpop.eup %2200 }
0x269b   :  { %v1593_v34 = vmul.f32 %v2201_v31, %v1498_v18 }
0x26fb   :  { %v1596_v32 = vpop.permute.xlu1 %1595 }
0x26fc   :  { %v1598_v33 = vmul.f32 %v2201_v31, %v1596_v32 }
0x26fe   :  { %1600 = vrot.lane.b32.xlu0 %v1598_v33, %s2261_s11 }
0x2770   :  { %v1601_v35 = vpop.permute.xlu0 %1600 }
0x2771   :  { %v1603_v36 = vadd.f32 %v1601_v35, %v1593_v34 }
0x2773   :  { %2202 = vtanh.f32 %v1603_v36 }
0x2780   :  { %v2203_v37 = vpop.eup %2202 }
0x2781   :  { %1606 = vrot.lane.b32.xlu1 %v2203_v37, %s2260_s10 }
0x27f3   :  { %v1607_v38 = vpop.permute.xlu1 %1606 }
0x27f4   :  { %v1609_v39 = vmul.f32 %v2201_v31, %v1607_v38 }
0x27f6   :  { %1611 = vrot.lane.b32.xlu0 %v1609_v39, %s2261_s11 }
0x2868   :  { %v1612_v40 = vpop.permute.xlu0 %1611 }
0x2869   :  { %1816 = vst.msk [vmem:[%s2697_s4 + $0x70] sm:$0xff] %vm27_vm0, %v1612_v40  ;;  %2075 = vmatmul.mubr.msk.f32.vlgmr.msra.gmra.mxu1 %vm27_vm0, %v1612_v40 }
0x2929   :  { %v1686_v42 = vpop.f32.mrf.mxu1 }
0x292a   :  { %v1690_v43 = vadd.f32 %v1817_v41, %v1686_v42 }
0x292b   :  { %v2076_v44 = vpop.f32.mrf.mxu1 }
0x292c   :  { %2204 = vtanh.f32 %v1690_v43  ;;  %v1819_v46 = vmul.f32 -1.442695, %v1690_v43 }
0x292e   :  { %2206 = vpow2.f32 %v1819_v46 }
0x2939   :  { %v2205_v45 = vpop.eup %2204 }
0x293a   :  { %1700 = vrot.lane.b32.xlu1 %v2205_v45, %s2260_s10 }
0x293b   :  { %v2207_v47 = vpop.eup %2206 }
0x293c   :  { %v1694_v48 = vadd.f32 1.0, %v2207_v47 }
0x293e   :  { %2208 = vrcp.f32 %v1694_v48 }
0x294b   :  { %v2209_v49 = vpop.eup %2208 }
0x294c   :  { %v1698_v51 = vmul.f32 %v2209_v49, %v1603_v36 }
0x29ac   :  { %v1701_v0 = vpop.permute.xlu1 %1700 }
0x29ad   :  { %v1703_v50 = vmul.f32 %v2209_v49, %v1701_v0 }
0x29af   :  { %1705 = vrot.lane.b32.xlu0 %v1703_v50, %s2261_s11 }
0x2a21   :  { %v1706_v52 = vpop.permute.xlu0 %1705 }
0x2a22   :  { %v1708_v2 = vadd.f32 %v1706_v52, %v1698_v51 }
0x2a24   :  { %2210 = vtanh.f32 %v1708_v2 }
0x2a31   :  { %v2211_v53 = vpop.eup %2210 }
0x2a32   :  { %1711 = vrot.lane.b32.xlu1 %v2211_v53, %s2260_s10 }
0x2a36   :  { %1723 = vrot.lane.b32.xlu1 %v1708_v2, %s2262_s0 }
0x2aa4   :  { %v1712_v54 = vpop.permute.xlu1 %1711 }
0x2aa5   :  { %v1714_v55 = vmul.f32 %v2209_v49, %v1712_v54 }
0x2aa7   :  { %1716 = vrot.lane.b32.xlu0 %v1714_v55, %s2261_s11 }
0x2aa8   :  { %v1724_v56 = vpop.permute.xlu1 %1723 }
0x2aa9   :  { %1726 = vst.msk [vmem:[#allocation4] sm:$0xff] %vm27_vm0, %v1724_v56 }
0x2aaa   :  { %2225 = shalt.err (!%p2222_p4)
}
0x2aab   :  { %1748 = dma.vmem_to_hbm [thread:$0]  %s1746_s27, 128, %s2699_s6, [#allocation5]  }
0x2aac   :  { %s2264_s29 = smov [#allocation2]  }
0x2aad   :  { %s1735_s30 = sshll.u32 %s2264_s29, 4  ;;  %s1736_s30 = int_to_ptr.vmem [resolvable:$true] %s1735_s30 }
0x2aae   :  { %s2234_s8 = scalar_lea.vmem %s1736_s30, 128  ;;  %p2239_p6 = scmp.lt.s32.totalorder %s1736_s30, %s1736_s30 }
0x2aaf   :  { %p2235_p5 = scmp.ne.s32.totalorder %s1736_s30, %s2234_s8  ;;  %p2240_p7 = scmp.lt.s32.totalorder %s2234_s8, %s2234_s8 }
0x2ab1   :  { %p2241_p8 = por %p2240_p7, %p2239_p6 }
0x2ab3   :  { %p2242_p9 = pnand %p2241_p8, %p2235_p5 }
0x2b19   :  { %v1717_v57 = vpop.permute.xlu0 %1716 }
0x2b1a   :  { %1820 = vst.msk [vmem:[%s2697_s4 + $0x78] sm:$0xff] %vm27_vm0, %v1717_v57  ;;  %1721 = vst.msk [vmem:[#allocation2] sm:$0xff] %vm27_vm0, %v1717_v57 }
0x2b1b   :  { %2245 = shalt.err (!%p2242_p9)
}
0x2b1c   :  { %1738 = dma.vmem_to_hbm [thread:$0]  %s1736_s30, 128, %s2698_s5, [#allocation3]  }
0x2b1d   :  { %2254 = dma.done.wait [#allocation3], 128  }
0x2b1e   :  { %2255 = vsyncadd [#allocation3], 4294967168 }
0x2b1f   :  { %2256 = dma.done.wait [#allocation5], 128  }
0x2b20   :  { %2257 = vsyncadd [#allocation5], 4294967168 }
0x2b21   :  { %1757 = vsyncpa [#allocation3], 1 }
0x2b22   :  { %1758 = vsyncpa [#allocation5], 1 }

</bundles_post_ra>
